<compile_context>
chip_gen: v7x
topology: tpu7x:2x2x1
jax: 0.10.0
libtpu: 0.0.40
codegen_flags: <defaults>
</compile_context>

<pallas_src>
from functools import partial

import jax
import jax.numpy as jnp
from jax import lax
from jax.experimental import pallas as pl
from jax.experimental.pallas import tpu as pltpu


# ------------------------------ small helpers -------------------------------

def _ln(x, g, eps=1e-5):
    """CT_CLIP LayerNorm: gain only, biased variance, eps=1e-5. f32 math."""
    mean = jnp.mean(x, axis=-1, keepdims=True)
    var = jnp.mean(jnp.square(x - mean), axis=-1, keepdims=True)
    return (x - mean) * lax.rsqrt(var + eps) * g


def _gelu_exact(x):
    """Exact (erf) GELU. erf via Abramowitz-Stegun 7.1.26 (|err| < 1.5e-7);
    uses only exp/abs/where so it lowers on every TPU generation."""
    z = x * 0.7071067811865476
    a = jnp.abs(z)
    t = 1.0 / (1.0 + 0.3275911 * a)
    poly = t * (0.254829592 + t * (-0.284496736 + t * (1.421413741
                + t * (-1.453152027 + t * 1.061405429))))
    erf_abs = 1.0 - poly * jnp.exp(-a * a)
    erf = jnp.where(z >= 0.0, erf_abs, -erf_abs)
    return 0.5 * x * (1.0 + erf)


def _full_spec(a):
    """Whole-array VMEM block (weights / gains); constant block index => resident."""
    nd = a.ndim
    return pl.BlockSpec(a.shape, lambda *_: (0,) * nd)


def _pick_embed_tile(m_rows, n, batch, target=512):
    """Row tile over flattened (B*n) patch rows: whole sequences per tile and a
    multiple of 8 rows (or the full array) so the BlockSpec is always legal."""
    best = m_rows
    for reps in range(1, batch + 1):
        tm = reps * n
        if batch % reps:
            continue
        if tm % 8 and tm != m_rows:
            continue
        if tm <= target:
            best = tm
    return best


def _pick_q_tile(n, target=256):
    """Largest multiple-of-8 divisor of n up to `target`, else the full n."""
    t = (min(target, n) // 8) * 8
    while t >= 8:
        if n % t == 0:
            return t
        t -= 8
    return n


# ------------------------------ Pallas kernels -------------------------------

def _embed_kernel(t_ref, w_ref, b_ref, pos_ref, g_ref, o_ref, *, seq_reps):
    # fused: patch Linear(+bias) + positional embedding + norm_in.
    # t_ref: (tm, patch_dim) bf16 rows (tm = seq_reps whole sequences).
    tok = jnp.dot(t_ref[...], w_ref[...], preferred_element_type=jnp.float32)
    pos = pos_ref[...]
    if seq_reps > 1:
        pos = jnp.concatenate([pos] * seq_reps, axis=0)        # static repeat
    tok = tok + b_ref[...] + pos
    o_ref[...] = _ln(tok, g_ref[...]).astype(o_ref.dtype)


def _layer_kernel(x_ref, g1_ref, wq_ref, wk_ref, wv_ref, wo_ref, g2_ref,
                  fg1_ref, w1a_ref, w1g_ref, fg2_ref, w2_ref,
                  o_ref, k_sc, v_sc, *, heads, scale, tq):
    # One fused transformer layer for a q-row tile of one batch element:
    #   prenorm -> per-head attention over the full (resident) sequence ->
    #   out-proj -> out-LN -> residual -> prenorm -> GEGLU -> LN -> W2 -> residual.
    qi = pl.program_id(1)
    dim = x_ref.shape[-1]

    # --- once per batch element: project K/V for the whole sequence into a
    #     persistent head-major VMEM scratch (reused by every q tile) ---------
    @pl.when(qi == 0)
    def _():
        xf = _ln(x_ref[0].astype(jnp.float32), g1_ref[...]).astype(jnp.bfloat16)

        def kv_body(h, c):
            k_sc[h] = jnp.dot(xf, wk_ref[h],
                              preferred_element_type=jnp.float32).astype(jnp.bfloat16)
            v_sc[h] = jnp.dot(xf, wv_ref[h],
                              preferred_element_type=jnp.float32).astype(jnp.bfloat16)
            return c

        lax.fori_loop(0, heads, kv_body, 0)

    # --- attention for this q-row tile ---------------------------------------
    row0 = pl.multiple_of(qi * tq, tq)
    xq = x_ref[0, pl.ds(row0, tq), :].astype(jnp.float32)          # (tq, dim)
    xqn = _ln(xq, g1_ref[...]).astype(jnp.bfloat16)

    def head_body(h, acc):
        qh = jnp.dot(xqn, wq_ref[h], preferred_element_type=jnp.float32)   # (tq, dh)
        kh = k_sc[h]                                                        # (n, dh) bf16
        vh = v_sc[h]
        # scale folded into the f32 score path
        s = lax.dot_general(qh.astype(jnp.bfloat16), kh,
                            (((1,), (1,)), ((), ())),
                            preferred_element_type=jnp.float32) * scale     # (tq, n)
        m = jnp.max(s, axis=-1, keepdims=True)
        p = jnp.exp(s - m)                                                  # f32 softmax
        inv = pl.reciprocal(jnp.sum(p, axis=-1, keepdims=True), approx=True)
        oh = jnp.dot((p * inv).astype(jnp.bfloat16), vh,
                     preferred_element_type=jnp.float32)                    # (tq, dh)
        # per-head slice of the output projection (head-major ref index)
        return acc + jnp.dot(oh.astype(jnp.bfloat16), wo_ref[h],
                             preferred_element_type=jnp.float32)            # (tq, dim)

    acc = lax.fori_loop(0, heads, head_body, jnp.zeros((tq, dim), jnp.float32))

    x_mid = xq + _ln(acc, g2_ref[...])                                      # attn residual

    # --- feedforward (GEGLU) on the same rows, fused in ----------------------
    h1 = _ln(x_mid, fg1_ref[...]).astype(jnp.bfloat16)
    val = jnp.dot(h1, w1a_ref[...], preferred_element_type=jnp.float32)     # value half
    gate = jnp.dot(h1, w1g_ref[...], preferred_element_type=jnp.float32)    # gate half
    hidden = _ln(val * _gelu_exact(gate), fg2_ref[...])
    ff = jnp.dot(hidden.astype(jnp.bfloat16), w2_ref[...],
                 preferred_element_type=jnp.float32)
    o_ref[0] = (x_mid + ff).astype(o_ref.dtype)


def _head_kernel(x_ref, g_ref, wc_ref, o_ref):
    # fused: norm_out + mean pool + to_cls Linear, written straight into the
    # (1+n, dim) output rows (cls at row 0) -> no wrapper-side concatenate.
    xn = _ln(x_ref[0].astype(jnp.float32), g_ref[...])            # (n, dim) f32
    pooled = jnp.mean(xn, axis=0, keepdims=True)                  # (1, dim) f32
    cls = jnp.dot(pooled, wc_ref[...], preferred_element_type=jnp.float32)
    o_ref[0] = jnp.concatenate([cls, xn], axis=0)                 # (1+n, dim)


# ------------------------------ kernel wrappers -------------------------------

def embed_block(t2d, w, b, pos, g, *, n, batch):
    m_rows, pd = t2d.shape
    dim = w.shape[1]
    tm = _pick_embed_tile(m_rows, n, batch)
    reps = tm // n
    return pl.pallas_call(
        partial(_embed_kernel, seq_reps=reps),
        out_shape=jax.ShapeDtypeStruct((m_rows, dim), jnp.bfloat16),
        grid=(m_rows // tm,),
        in_specs=[pl.BlockSpec((tm, pd), lambda i: (i, 0)),
                  _full_spec(w), _full_spec(b), _full_spec(pos), _full_spec(g)],
        out_specs=pl.BlockSpec((tm, dim), lambda i: (i, 0)),
        compiler_params=pltpu.CompilerParams(dimension_semantics=("parallel",)),
    )(t2d, w, b, pos, g)


def layer_block(x, lp, *, heads, dh, scale):
    B, n, dim = x.shape
    tq = _pick_q_tile(n)
    w_args = (lp["attn_g"], lp["wq"], lp["wk"], lp["wv"], lp["wo"],
              lp["attn_out_g"], lp["ff_g"], lp["w1a"], lp["w1g"],
              lp["ff_ln_g"], lp["w2"])
    return pl.pallas_call(
        partial(_layer_kernel, heads=heads, scale=scale, tq=tq),
        out_shape=jax.ShapeDtypeStruct((B, n, dim), jnp.bfloat16),
        grid=(B, n // tq),
        in_specs=[pl.BlockSpec((1, n, dim), lambda bb, qq: (bb, 0, 0))]
                 + [_full_spec(a) for a in w_args],
        out_specs=pl.BlockSpec((1, tq, dim), lambda bb, qq: (bb, qq, 0)),
        scratch_shapes=[pltpu.VMEM((heads, n, dh), jnp.bfloat16),   # K (head-major)
                        pltpu.VMEM((heads, n, dh), jnp.bfloat16)],  # V (head-major)
        compiler_params=pltpu.CompilerParams(
            # q-tile axis must stay sequential: K/V scratch is filled at qi == 0.
            dimension_semantics=("parallel", "arbitrary")),
    )(x, *w_args)


def head_block(x, g, wc):
    B, n, dim = x.shape
    return pl.pallas_call(
        _head_kernel,
        out_shape=jax.ShapeDtypeStruct((B, 1 + n, dim), jnp.float32),
        grid=(B,),
        in_specs=[pl.BlockSpec((1, n, dim), lambda bb: (bb, 0, 0)),
                  _full_spec(g), _full_spec(wc)],
        out_specs=pl.BlockSpec((1, 1 + n, dim), lambda bb: (bb, 0, 0)),
        compiler_params=pltpu.CompilerParams(dimension_semantics=("parallel",)),
    )(x, g, wc)


# ------------------------------ parameter init -------------------------------

def init_params(key, cfg):
    dim = cfg["dim"]
    p = cfg["patch_size"]
    C = cfg["channels"]
    patch_dim = C * p * p
    num_patches = (cfg["image_size"] // p) ** 2
    heads, dh = cfg["heads"], cfg["dim_head"]
    ff_inner = dim * cfg["ff_mult"]

    keys = iter(jax.random.split(key, 4 + cfg["depth"] * 7))

    def w(shape, dtype=jnp.bfloat16, s=0.02):
        return (jax.random.normal(next(keys), shape, jnp.float32) * s).astype(dtype)

    params = {
        "patch_w": w((patch_dim, dim)),                     # bf16 MXU weight
        "patch_b": w((1, dim), jnp.float32),
        "pos_emb": w((num_patches, dim), jnp.float32),
        "norm_in_g": jnp.ones((1, dim), jnp.float32),
        "norm_out_g": jnp.ones((1, dim), jnp.float32),
        "cls_w": w((dim, dim), jnp.float32),                # tiny, keep f32
        "layers": [],
    }
    for _ in range(cfg["depth"]):
        params["layers"].append({
            "attn_g": jnp.ones((1, dim), jnp.float32),
            "wq": w((heads, dim, dh)),                      # head-major QKV weights
            "wk": w((heads, dim, dh)),
            "wv": w((heads, dim, dh)),
            "wo": w((heads, dh, dim)),                      # head-major out-proj
            "attn_out_g": jnp.ones((1, dim), jnp.float32),
            "ff_g": jnp.ones((1, dim), jnp.float32),
            "w1a": w((dim, ff_inner)),                      # GEGLU value half
            "w1g": w((dim, ff_inner)),                      # GEGLU gate  half
            "ff_ln_g": jnp.ones((1, ff_inner), jnp.float32),
            "w2": w((ff_inner, dim)),
        })
    return params


# ------------------------------- forward pass --------------------------------

def vit_forward(x, params, cfg):
    B, C, H, W = x.shape
    p = cfg["patch_size"]
    Hp, Wp = H // p, W // p
    n = Hp * Wp
    dim = cfg["dim"]
    heads, dh = cfg["heads"], cfg["dim_head"]
    scale = dh ** (-0.5)

    # 'b c (h p1) (w p2) -> b (h w) (p1 p2 c)' — pure layout glue; compute is in Pallas
    t = (x.reshape(B, C, Hp, p, Wp, p)
          .transpose(0, 2, 4, 3, 5, 1)
          .reshape(B * n, p * p * C)
          .astype(jnp.bfloat16))

    # fused: patch Linear + bias + pos_emb + norm_in, row-tiled over B*n rows.
    # TODO(synk): PatchDropout / nn.Dropout are training-only stochastic ops -> identity here.
    tok = embed_block(t, params["patch_w"], params["patch_b"],
                      params["pos_emb"][:n], params["norm_in_g"],
                      n=n, batch=B).reshape(B, n, dim)              # (B, n, dim) bf16

    for lp in params["layers"]:
        tok = layer_block(tok, lp, heads=heads, dh=dh, scale=scale)  # bf16 residual

    # fused: norm_out + mean pool + cls Linear, written into (B, 1+n, dim)
    return head_block(tok, params["norm_out_g"], params["cls_w"])    # f32


# ----------------------------------- main -------------------------------------

if __name__ == "__main__":
    cfg = dict(
        dim=32,
        image_size=16,
        patch_size=8,
        channels=4,
        depth=2,
        heads=4,
        dim_head=8,
        ff_mult=4,
    )
    key = jax.random.PRNGKey(0)
    k_x, k_p = jax.random.split(key)
    x = jax.random.normal(
        k_x, (2, cfg["channels"], cfg["image_size"], cfg["image_size"]), jnp.float32
    )
    params = init_params(k_p, cfg)

    fwd = jax.jit(partial(vit_forward, cfg=cfg))
    out = jax.block_until_ready(fwd(x, params))

    n_patches = (cfg["image_size"] // cfg["patch_size"]) ** 2
    assert out.shape == (2, 1 + n_patches, cfg["dim"]), out.shape
    assert bool(jnp.all(jnp.isfinite(out)))
    print("KERNEL_OK")
</pallas_src>

<mosaic_0001>
module attributes {stable_mosaic.version = 11 : i64} {
  func.func @_embed_kernel(%arg0: i32, %arg1: memref<8x256xbf16, #tpu.memory_space<vmem>>, %arg2: memref<256x32xbf16, #tpu.memory_space<vmem>>, %arg3: memref<1x32xf32, #tpu.memory_space<vmem>>, %arg4: memref<4x32xf32, #tpu.memory_space<vmem>>, %arg5: memref<1x32xf32, #tpu.memory_space<vmem>>, %arg6: memref<8x32xbf16, #tpu.memory_space<vmem>>) attributes {dimension_semantics = [#tpu.dimension_semantics<parallel>], iteration_bounds = array<i64: 1>, scalar_prefetch = 0 : i64, scratch_operands = 0 : i64, tpu.core_type = #tpu.core_type<tc>, window_params = [{transform_indices = @transform_0, window_bounds = array<i64: 8, 256>}, {pipeline_mode = #tpu.pipeline_mode<synchronous>, transform_indices = @transform_1, window_bounds = array<i64: 256, 32>}, {pipeline_mode = #tpu.pipeline_mode<synchronous>, transform_indices = @transform_2, window_bounds = array<i64: 1, 32>}, {pipeline_mode = #tpu.pipeline_mode<synchronous>, transform_indices = @transform_3, window_bounds = array<i64: 4, 32>}, {pipeline_mode = #tpu.pipeline_mode<synchronous>, transform_indices = @transform_4, window_bounds = array<i64: 1, 32>}, {transform_indices = @transform_5, window_bounds = array<i64: 8, 32>}]} {
    %c0 = arith.constant 0 : index
    %c0_0 = arith.constant 0 : index
    %0 = vector.load %arg1[%c0, %c0_0] : memref<8x256xbf16, #tpu.memory_space<vmem>>, vector<8x256xbf16>
    %c0_1 = arith.constant 0 : index
    %c0_2 = arith.constant 0 : index
    %1 = vector.load %arg2[%c0_1, %c0_2] : memref<256x32xbf16, #tpu.memory_space<vmem>>, vector<256x32xbf16>
    %cst = arith.constant dense<0.000000e+00> : vector<8x32xf32>
    %2 = tpu.matmul %0, %1, %cst {dimension_numbers = #tpu.dot_dimension_numbers<[1], [0], [0], [1], [0, 0, 1, 1], [], []>} : vector<8x256xbf16>, vector<256x32xbf16>, vector<8x32xf32> -> vector<8x32xf32>
    %c0_3 = arith.constant 0 : index
    %c0_4 = arith.constant 0 : index
    %3 = vector.load %arg4[%c0_3, %c0_4] : memref<4x32xf32, #tpu.memory_space<vmem>>, vector<4x32xf32>
    %4 = tpu.concatenate %3, %3 in 0 : vector<4x32xf32>, vector<4x32xf32> -> vector<8x32xf32>
    %c0_5 = arith.constant 0 : index
    %c0_6 = arith.constant 0 : index
    %5 = vector.load %arg3[%c0_5, %c0_6] : memref<1x32xf32, #tpu.memory_space<vmem>>, vector<1x32xf32>
    %6 = vector.broadcast %5 : vector<1x32xf32> to vector<8x32xf32>
    %7 = arith.addf %2, %6 : vector<8x32xf32>
    %8 = arith.addf %7, %4 : vector<8x32xf32>
    %c0_7 = arith.constant 0 : index
    %c0_8 = arith.constant 0 : index
    %9 = vector.load %arg5[%c0_7, %c0_8] : memref<1x32xf32, #tpu.memory_space<vmem>>, vector<1x32xf32>
    %cst_9 = arith.constant dense<0.000000e+00> : vector<8xf32>
    %10 = vector.multi_reduction <add>, %8, %cst_9 [1] : vector<8x32xf32> to vector<8xf32>
    %11 = vector.shape_cast %10 : vector<8xf32> to vector<8x1xf32>
    %cst_10 = arith.constant 3.200000e+01 : f32
    %12 = vector.broadcast %cst_10 : f32 to vector<8x1xf32>
    %13 = arith.divf %11, %12 : vector<8x1xf32>
    %14 = vector.broadcast %13 : vector<8x1xf32> to vector<8x32xf32>
    %15 = arith.subf %8, %14 : vector<8x32xf32>
    %16 = arith.mulf %15, %15 : vector<8x32xf32>
    %cst_11 = arith.constant dense<0.000000e+00> : vector<8xf32>
    %17 = vector.multi_reduction <add>, %16, %cst_11 [1] : vector<8x32xf32> to vector<8xf32>
    %18 = vector.shape_cast %17 : vector<8xf32> to vector<8x1xf32>
    %cst_12 = arith.constant 3.200000e+01 : f32
    %19 = vector.broadcast %cst_12 : f32 to vector<8x1xf32>
    %20 = arith.divf %18, %19 : vector<8x1xf32>
    %21 = vector.broadcast %13 : vector<8x1xf32> to vector<8x32xf32>
    %22 = arith.subf %8, %21 : vector<8x32xf32>
    %cst_13 = arith.constant 9.99999974E-6 : f32
    %23 = vector.broadcast %cst_13 : f32 to vector<8x1xf32>
    %24 = arith.addf %20, %23 : vector<8x1xf32>
    %25 = math.rsqrt %24 : vector<8x1xf32>
    %26 = vector.broadcast %25 : vector<8x1xf32> to vector<8x32xf32>
    %27 = arith.mulf %22, %26 : vector<8x32xf32>
    %28 = vector.broadcast %9 : vector<1x32xf32> to vector<8x32xf32>
    %29 = arith.mulf %27, %28 : vector<8x32xf32>
    %30 = arith.truncf %29 : vector<8x32xf32> to vector<8x32xbf16>
    %c0_14 = arith.constant 0 : index
    %c0_15 = arith.constant 0 : index
    %31 = vector.load %arg6[%c0_14, %c0_15] : memref<8x32xbf16, #tpu.memory_space<vmem>>, vector<8x32xbf16>
    tpu.vector_store %arg6[%c0_14, %c0_15], %30 {strides = array<i32>} : memref<8x32xbf16, #tpu.memory_space<vmem>>, vector<8x32xbf16>,
    return
  }
  func.func @transform_0(%arg0: i32) -> (i32, i32) {
    %c0_i32 = arith.constant 0 : i32
    %c0_i32_0 = arith.constant 0 : i32
    return %arg0, %c0_i32 : i32, i32
  }
  func.func @transform_1(%arg0: i32) -> (i32, i32) {
    %c0_i32 = arith.constant 0 : i32
    %c0_i32_0 = arith.constant 0 : i32
    %c0_i32_1 = arith.constant 0 : i32
    return %c0_i32, %c0_i32_0 : i32, i32
  }
  func.func @transform_2(%arg0: i32) -> (i32, i32) {
    %c0_i32 = arith.constant 0 : i32
    %c0_i32_0 = arith.constant 0 : i32
    %c0_i32_1 = arith.constant 0 : i32
    return %c0_i32, %c0_i32_0 : i32, i32
  }
  func.func @transform_3(%arg0: i32) -> (i32, i32) {
    %c0_i32 = arith.constant 0 : i32
    %c0_i32_0 = arith.constant 0 : i32
    %c0_i32_1 = arith.constant 0 : i32
    return %c0_i32, %c0_i32_0 : i32, i32
  }
  func.func @transform_4(%arg0: i32) -> (i32, i32) {
    %c0_i32 = arith.constant 0 : i32
    %c0_i32_0 = arith.constant 0 : i32
    %c0_i32_1 = arith.constant 0 : i32
    return %c0_i32, %c0_i32_0 : i32, i32
  }
  func.func @transform_5(%arg0: i32) -> (i32, i32) {
    %c0_i32 = arith.constant 0 : i32
    %c0_i32_0 = arith.constant 0 : i32
    return %arg0, %c0_i32 : i32, i32
  }
}

module attributes {stable_mosaic.version = 11 : i64} {
  func.func @_head_kernel(%arg0: i32, %arg1: memref<1x4x32xbf16, #tpu.memory_space<vmem>>, %arg2: memref<1x32xf32, #tpu.memory_space<vmem>>, %arg3: memref<32x32xf32, #tpu.memory_space<vmem>>, %arg4: memref<1x5x32xf32, #tpu.memory_space<vmem>>) attributes {dimension_semantics = [#tpu.dimension_semantics<parallel>], iteration_bounds = array<i64: 2>, scalar_prefetch = 0 : i64, scratch_operands = 0 : i64, tpu.core_type = #tpu.core_type<tc>, window_params = [{transform_indices = @transform_0, window_bounds = array<i64: 1, 4, 32>}, {pipeline_mode = #tpu.pipeline_mode<synchronous>, transform_indices = @transform_1, window_bounds = array<i64: 1, 32>}, {pipeline_mode = #tpu.pipeline_mode<synchronous>, transform_indices = @transform_2, window_bounds = array<i64: 32, 32>}, {transform_indices = @transform_3, window_bounds = array<i64: 1, 5, 32>}]} {
    %c0 = arith.constant 0 : index
    %c0_0 = arith.constant 0 : index
    %c0_1 = arith.constant 0 : index
    %0 = vector.load %arg1[%c0, %c0_0, %c0_1] : memref<1x4x32xbf16, #tpu.memory_space<vmem>>, vector<1x4x32xbf16>
    %1 = vector.shape_cast %0 : vector<1x4x32xbf16> to vector<4x32xbf16>
    %2 = arith.extf %1 : vector<4x32xbf16> to vector<4x32xf32>
    %c0_2 = arith.constant 0 : index
    %c0_3 = arith.constant 0 : index
    %3 = vector.load %arg2[%c0_2, %c0_3] : memref<1x32xf32, #tpu.memory_space<vmem>>, vector<1x32xf32>
    %cst = arith.constant dense<0.000000e+00> : vector<4xf32>
    %4 = vector.multi_reduction <add>, %2, %cst [1] : vector<4x32xf32> to vector<4xf32>
    %5 = vector.shape_cast %4 : vector<4xf32> to vector<4x1xf32>
    %cst_4 = arith.constant 3.200000e+01 : f32
    %6 = vector.broadcast %cst_4 : f32 to vector<4x1xf32>
    %7 = arith.divf %5, %6 : vector<4x1xf32>
    %8 = vector.broadcast %7 : vector<4x1xf32> to vector<4x32xf32>
    %9 = arith.subf %2, %8 : vector<4x32xf32>
    %10 = arith.mulf %9, %9 : vector<4x32xf32>
    %cst_5 = arith.constant dense<0.000000e+00> : vector<4xf32>
    %11 = vector.multi_reduction <add>, %10, %cst_5 [1] : vector<4x32xf32> to vector<4xf32>
    %12 = vector.shape_cast %11 : vector<4xf32> to vector<4x1xf32>
    %cst_6 = arith.constant 3.200000e+01 : f32
    %13 = vector.broadcast %cst_6 : f32 to vector<4x1xf32>
    %14 = arith.divf %12, %13 : vector<4x1xf32>
    %15 = vector.broadcast %7 : vector<4x1xf32> to vector<4x32xf32>
    %16 = arith.subf %2, %15 : vector<4x32xf32>
    %cst_7 = arith.constant 9.99999974E-6 : f32
    %17 = vector.broadcast %cst_7 : f32 to vector<4x1xf32>
    %18 = arith.addf %14, %17 : vector<4x1xf32>
    %19 = math.rsqrt %18 : vector<4x1xf32>
    %20 = vector.broadcast %19 : vector<4x1xf32> to vector<4x32xf32>
    %21 = arith.mulf %16, %20 : vector<4x32xf32>
    %22 = vector.broadcast %3 : vector<1x32xf32> to vector<4x32xf32>
    %23 = arith.mulf %21, %22 : vector<4x32xf32>
    %cst_8 = arith.constant dense<0.000000e+00> : vector<32xf32>
    %24 = vector.multi_reduction <add>, %23, %cst_8 [0] : vector<4x32xf32> to vector<32xf32>
    %25 = vector.shape_cast %24 : vector<32xf32> to vector<1x32xf32>
    %cst_9 = arith.constant 4.000000e+00 : f32
    %26 = vector.broadcast %cst_9 : f32 to vector<1x32xf32>
    %27 = arith.divf %25, %26 : vector<1x32xf32>
    %c0_10 = arith.constant 0 : index
    %c0_11 = arith.constant 0 : index
    %28 = vector.load %arg3[%c0_10, %c0_11] : memref<32x32xf32, #tpu.memory_space<vmem>>, vector<32x32xf32>
    %cst_12 = arith.constant dense<0.000000e+00> : vector<1x32xf32>
    %29 = tpu.matmul %27, %28, %cst_12 {dimension_numbers = #tpu.dot_dimension_numbers<[1], [0], [0], [1], [0, 0, 1, 1], [], []>} : vector<1x32xf32>, vector<32x32xf32>, vector<1x32xf32> -> vector<1x32xf32>
    %30 = tpu.concatenate %29, %23 in 0 : vector<1x32xf32>, vector<4x32xf32> -> vector<5x32xf32>
    %c0_13 = arith.constant 0 : index
    %c0_14 = arith.constant 0 : index
    %c0_15 = arith.constant 0 : index
    %31 = vector.load %arg4[%c0_13, %c0_14, %c0_15] : memref<1x5x32xf32, #tpu.memory_space<vmem>>, vector<1x5x32xf32>
    %32 = vector.shape_cast %31 : vector<1x5x32xf32> to vector<5x32xf32>
    %33 = vector.shape_cast %30 : vector<5x32xf32> to vector<1x5x32xf32>
    tpu.vector_store %arg4[%c0_13, %c0_14, %c0_15], %33 {strides = array<i32>} : memref<1x5x32xf32, #tpu.memory_space<vmem>>, vector<1x5x32xf32>,
    return
  }
  func.func @transform_0(%arg0: i32) -> (i32, i32, i32) {
    %c0_i32 = arith.constant 0 : i32
    %c0_i32_0 = arith.constant 0 : i32
    %c0_i32_1 = arith.constant 0 : i32
    return %arg0, %c0_i32, %c0_i32_0 : i32, i32, i32
  }
  func.func @transform_1(%arg0: i32) -> (i32, i32) {
    %c0_i32 = arith.constant 0 : i32
    %c0_i32_0 = arith.constant 0 : i32
    %c0_i32_1 = arith.constant 0 : i32
    return %c0_i32, %c0_i32_0 : i32, i32
  }
  func.func @transform_2(%arg0: i32) -> (i32, i32) {
    %c0_i32 = arith.constant 0 : i32
    %c0_i32_0 = arith.constant 0 : i32
    %c0_i32_1 = arith.constant 0 : i32
    return %c0_i32, %c0_i32_0 : i32, i32
  }
  func.func @transform_3(%arg0: i32) -> (i32, i32, i32) {
    %c0_i32 = arith.constant 0 : i32
    %c0_i32_0 = arith.constant 0 : i32
    %c0_i32_1 = arith.constant 0 : i32
    return %arg0, %c0_i32, %c0_i32_0 : i32, i32, i32
  }
}

module attributes {stable_mosaic.version = 11 : i64} {
  func.func @_layer_kernel(%arg0: i32, %arg1: i32, %arg2: memref<1x4x32xbf16, #tpu.memory_space<vmem>>, %arg3: memref<1x32xf32, #tpu.memory_space<vmem>>, %arg4: memref<4x32x8xbf16, #tpu.memory_space<vmem>>, %arg5: memref<4x32x8xbf16, #tpu.memory_space<vmem>>, %arg6: memref<4x32x8xbf16, #tpu.memory_space<vmem>>, %arg7: memref<4x8x32xbf16, #tpu.memory_space<vmem>>, %arg8: memref<1x32xf32, #tpu.memory_space<vmem>>, %arg9: memref<1x32xf32, #tpu.memory_space<vmem>>, %arg10: memref<32x128xbf16, #tpu.memory_space<vmem>>, %arg11: memref<32x128xbf16, #tpu.memory_space<vmem>>, %arg12: memref<1x128xf32, #tpu.memory_space<vmem>>, %arg13: memref<128x32xbf16, #tpu.memory_space<vmem>>, %arg14: memref<1x4x32xbf16, #tpu.memory_space<vmem>>, %arg15: memref<4x4x8xbf16, #tpu.memory_space<vmem>>, %arg16: memref<4x4x8xbf16, #tpu.memory_space<vmem>>) attributes {dimension_semantics = [#tpu.dimension_semantics<parallel>, #tpu.dimension_semantics<arbitrary>], iteration_bounds = array<i64: 2, 1>, scalar_prefetch = 0 : i64, scratch_operands = 2 : i64, tpu.core_type = #tpu.core_type<tc>, window_params = [{transform_indices = @transform_0, window_bounds = array<i64: 1, 4, 32>}, {pipeline_mode = #tpu.pipeline_mode<synchronous>, transform_indices = @transform_1, window_bounds = array<i64: 1, 32>}, {pipeline_mode = #tpu.pipeline_mode<synchronous>, transform_indices = @transform_2, window_bounds = array<i64: 4, 32, 8>}, {pipeline_mode = #tpu.pipeline_mode<synchronous>, transform_indices = @transform_3, window_bounds = array<i64: 4, 32, 8>}, {pipeline_mode = #tpu.pipeline_mode<synchronous>, transform_indices = @transform_4, window_bounds = array<i64: 4, 32, 8>}, {pipeline_mode = #tpu.pipeline_mode<synchronous>, transform_indices = @transform_5, window_bounds = array<i64: 4, 8, 32>}, {pipeline_mode = #tpu.pipeline_mode<synchronous>, transform_indices = @transform_6, window_bounds = array<i64: 1, 32>}, {pipeline_mode = #tpu.pipeline_mode<synchronous>, transform_indices = @transform_7, window_bounds = array<i64: 1, 32>}, {pipeline_mode = #tpu.pipeline_mode<synchronous>, transform_indices = @transform_8, window_bounds = array<i64: 32, 128>}, {pipeline_mode = #tpu.pipeline_mode<synchronous>, transform_indices = @transform_9, window_bounds = array<i64: 32, 128>}, {pipeline_mode = #tpu.pipeline_mode<synchronous>, transform_indices = @transform_10, window_bounds = array<i64: 1, 128>}, {pipeline_mode = #tpu.pipeline_mode<synchronous>, transform_indices = @transform_11, window_bounds = array<i64: 128, 32>}, {transform_indices = @transform_12, window_bounds = array<i64: 1, 4, 32>}]} {
    %c0_i32 = arith.constant 0 : i32
    %0 = arith.cmpi eq, %arg1, %c0_i32 : i32
    %1 = arith.extui %0 : i1 to i32
    %c0_i32_0 = arith.constant 0 : i32
    %2 = arith.cmpi ne, %1, %c0_i32_0 : i32
    scf.if %2 {
      %c0_60 = arith.constant 0 : index
      %c0_61 = arith.constant 0 : index
      %c0_62 = arith.constant 0 : index
      %152 = vector.load %arg2[%c0_60, %c0_61, %c0_62] : memref<1x4x32xbf16, #tpu.memory_space<vmem>>, vector<1x4x32xbf16>
      %153 = vector.shape_cast %152 : vector<1x4x32xbf16> to vector<4x32xbf16>
      %154 = arith.extf %153 : vector<4x32xbf16> to vector<4x32xf32>
      %c0_63 = arith.constant 0 : index
      %c0_64 = arith.constant 0 : index
      %155 = vector.load %arg3[%c0_63, %c0_64] : memref<1x32xf32, #tpu.memory_space<vmem>>, vector<1x32xf32>
      %cst_65 = arith.constant dense<0.000000e+00> : vector<4xf32>
      %156 = vector.multi_reduction <add>, %154, %cst_65 [1] : vector<4x32xf32> to vector<4xf32>
      %157 = vector.shape_cast %156 : vector<4xf32> to vector<4x1xf32>
      %cst_66 = arith.constant 3.200000e+01 : f32
      %158 = vector.broadcast %cst_66 : f32 to vector<4x1xf32>
      %159 = arith.divf %157, %158 : vector<4x1xf32>
      %160 = vector.broadcast %159 : vector<4x1xf32> to vector<4x32xf32>
      %161 = arith.subf %154, %160 : vector<4x32xf32>
      %162 = arith.mulf %161, %161 : vector<4x32xf32>
      %cst_67 = arith.constant dense<0.000000e+00> : vector<4xf32>
      %163 = vector.multi_reduction <add>, %162, %cst_67 [1] : vector<4x32xf32> to vector<4xf32>
      %164 = vector.shape_cast %163 : vector<4xf32> to vector<4x1xf32>
      %cst_68 = arith.constant 3.200000e+01 : f32
      %165 = vector.broadcast %cst_68 : f32 to vector<4x1xf32>
      %166 = arith.divf %164, %165 : vector<4x1xf32>
      %167 = vector.broadcast %159 : vector<4x1xf32> to vector<4x32xf32>
      %168 = arith.subf %154, %167 : vector<4x32xf32>
      %cst_69 = arith.constant 9.99999974E-6 : f32
      %169 = vector.broadcast %cst_69 : f32 to vector<4x1xf32>
      %170 = arith.addf %166, %169 : vector<4x1xf32>
      %171 = math.rsqrt %170 : vector<4x1xf32>
      %172 = vector.broadcast %171 : vector<4x1xf32> to vector<4x32xf32>
      %173 = arith.mulf %168, %172 : vector<4x32xf32>
      %174 = vector.broadcast %155 : vector<1x32xf32> to vector<4x32xf32>
      %175 = arith.mulf %173, %174 : vector<4x32xf32>
      %176 = arith.truncf %175 : vector<4x32xf32> to vector<4x32xbf16>
      %c0_i32_70 = arith.constant 0 : i32
      %c4_i32_71 = arith.constant 4 : i32
      %177 = arith.addi %c0_i32_70, %c4_i32_71 : i32
      %c1_i32_72 = arith.constant 1 : i32
      scf.for %arg17 = %c0_i32_70 to %177 step %c1_i32_72  : i32 {
        %178 = arith.index_cast %arg17 : i32 to index
        %c0_74 = arith.constant 0 : index
        %c0_75 = arith.constant 0 : index
        %179 = vector.load %arg5[%178, %c0_74, %c0_75] : memref<4x32x8xbf16, #tpu.memory_space<vmem>>, vector<1x32x8xbf16>
        %180 = vector.shape_cast %179 : vector<1x32x8xbf16> to vector<32x8xbf16>
        %cst_76 = arith.constant dense<0.000000e+00> : vector<4x8xf32>
        %181 = tpu.matmul %176, %180, %cst_76 {dimension_numbers = #tpu.dot_dimension_numbers<[1], [0], [0], [1], [0, 0, 1, 1], [], []>} : vector<4x32xbf16>, vector<32x8xbf16>, vector<4x8xf32> -> vector<4x8xf32>
        %182 = arith.truncf %181 : vector<4x8xf32> to vector<4x8xbf16>
        %183 = arith.index_cast %arg17 : i32 to index
        %c0_77 = arith.constant 0 : index
        %c0_78 = arith.constant 0 : index
        %184 = vector.load %arg15[%183, %c0_77, %c0_78] : memref<4x4x8xbf16, #tpu.memory_space<vmem>>, vector<1x4x8xbf16>
        %185 = vector.shape_cast %184 : vector<1x4x8xbf16> to vector<4x8xbf16>
        %186 = vector.shape_cast %182 : vector<4x8xbf16> to vector<1x4x8xbf16>
        tpu.vector_store %arg15[%183, %c0_77, %c0_78], %186 {strides = array<i32>} : memref<4x4x8xbf16, #tpu.memory_space<vmem>>, vector<1x4x8xbf16>,
        %187 = arith.index_cast %arg17 : i32 to index
        %c0_79 = arith.constant 0 : index
        %c0_80 = arith.constant 0 : index
        %188 = vector.load %arg6[%187, %c0_79, %c0_80] : memref<4x32x8xbf16, #tpu.memory_space<vmem>>, vector<1x32x8xbf16>
        %189 = vector.shape_cast %188 : vector<1x32x8xbf16> to vector<32x8xbf16>
        %cst_81 = arith.constant dense<0.000000e+00> : vector<4x8xf32>
        %190 = tpu.matmul %176, %189, %cst_81 {dimension_numbers = #tpu.dot_dimension_numbers<[1], [0], [0], [1], [0, 0, 1, 1], [], []>} : vector<4x32xbf16>, vector<32x8xbf16>, vector<4x8xf32> -> vector<4x8xf32>
        %191 = arith.truncf %190 : vector<4x8xf32> to vector<4x8xbf16>
        %192 = arith.index_cast %arg17 : i32 to index
        %c0_82 = arith.constant 0 : index
        %c0_83 = arith.constant 0 : index
        %193 = vector.load %arg16[%192, %c0_82, %c0_83] : memref<4x4x8xbf16, #tpu.memory_space<vmem>>, vector<1x4x8xbf16>
        %194 = vector.shape_cast %193 : vector<1x4x8xbf16> to vector<4x8xbf16>
        %195 = vector.shape_cast %191 : vector<4x8xbf16> to vector<1x4x8xbf16>
        tpu.vector_store %arg16[%192, %c0_82, %c0_83], %195 {strides = array<i32>} : memref<4x4x8xbf16, #tpu.memory_space<vmem>>, vector<1x4x8xbf16>,
      }
      %c4_i32_73 = arith.constant 4 : i32
    } else {
    }
    %c4_i32 = arith.constant 4 : i32
    %3 = arith.muli %arg1, %c4_i32 : i32
    %4 = tpu.assume_multiple %3, 4 : i32
    %c0 = arith.constant 0 : index
    %5 = arith.index_cast %4 : i32 to index
    %c0_1 = arith.constant 0 : index
    %6 = vector.load %arg2[%c0, %5, %c0_1] : memref<1x4x32xbf16, #tpu.memory_space<vmem>>, vector<1x4x32xbf16>
    %7 = vector.shape_cast %6 : vector<1x4x32xbf16> to vector<4x32xbf16>
    %8 = arith.extf %7 : vector<4x32xbf16> to vector<4x32xf32>
    %c0_2 = arith.constant 0 : index
    %c0_3 = arith.constant 0 : index
    %9 = vector.load %arg3[%c0_2, %c0_3] : memref<1x32xf32, #tpu.memory_space<vmem>>, vector<1x32xf32>
    %cst = arith.constant dense<0.000000e+00> : vector<4xf32>
    %10 = vector.multi_reduction <add>, %8, %cst [1] : vector<4x32xf32> to vector<4xf32>
    %11 = vector.shape_cast %10 : vector<4xf32> to vector<4x1xf32>
    %cst_4 = arith.constant 3.200000e+01 : f32
    %12 = vector.broadcast %cst_4 : f32 to vector<4x1xf32>
    %13 = arith.divf %11, %12 : vector<4x1xf32>
    %14 = vector.broadcast %13 : vector<4x1xf32> to vector<4x32xf32>
    %15 = arith.subf %8, %14 : vector<4x32xf32>
    %16 = arith.mulf %15, %15 : vector<4x32xf32>
    %cst_5 = arith.constant dense<0.000000e+00> : vector<4xf32>
    %17 = vector.multi_reduction <add>, %16, %cst_5 [1] : vector<4x32xf32> to vector<4xf32>
    %18 = vector.shape_cast %17 : vector<4xf32> to vector<4x1xf32>
    %cst_6 = arith.constant 3.200000e+01 : f32
    %19 = vector.broadcast %cst_6 : f32 to vector<4x1xf32>
    %20 = arith.divf %18, %19 : vector<4x1xf32>
    %21 = vector.broadcast %13 : vector<4x1xf32> to vector<4x32xf32>
    %22 = arith.subf %8, %21 : vector<4x32xf32>
    %cst_7 = arith.constant 9.99999974E-6 : f32
    %23 = vector.broadcast %cst_7 : f32 to vector<4x1xf32>
    %24 = arith.addf %20, %23 : vector<4x1xf32>
    %25 = math.rsqrt %24 : vector<4x1xf32>
    %26 = vector.broadcast %25 : vector<4x1xf32> to vector<4x32xf32>
    %27 = arith.mulf %22, %26 : vector<4x32xf32>
    %28 = vector.broadcast %9 : vector<1x32xf32> to vector<4x32xf32>
    %29 = arith.mulf %27, %28 : vector<4x32xf32>
    %30 = arith.truncf %29 : vector<4x32xf32> to vector<4x32xbf16>
    %cst_8 = arith.constant 0.000000e+00 : f32
    %31 = vector.broadcast %cst_8 : f32 to vector<4x32xf32>
    %c0_i32_9 = arith.constant 0 : i32
    %c4_i32_10 = arith.constant 4 : i32
    %32 = arith.addi %c0_i32_9, %c4_i32_10 : i32
    %c1_i32 = arith.constant 1 : i32
    %33 = scf.for %arg17 = %c0_i32_9 to %32 step %c1_i32 iter_args(%arg18 = %31) -> (vector<4x32xf32>)  : i32 {
      %152 = arith.index_cast %arg17 : i32 to index
      %c0_60 = arith.constant 0 : index
      %c0_61 = arith.constant 0 : index
      %153 = vector.load %arg4[%152, %c0_60, %c0_61] : memref<4x32x8xbf16, #tpu.memory_space<vmem>>, vector<1x32x8xbf16>
      %154 = vector.shape_cast %153 : vector<1x32x8xbf16> to vector<32x8xbf16>
      %cst_62 = arith.constant dense<0.000000e+00> : vector<4x8xf32>
      %155 = tpu.matmul %30, %154, %cst_62 {dimension_numbers = #tpu.dot_dimension_numbers<[1], [0], [0], [1], [0, 0, 1, 1], [], []>} : vector<4x32xbf16>, vector<32x8xbf16>, vector<4x8xf32> -> vector<4x8xf32>
      %156 = arith.index_cast %arg17 : i32 to index
      %c0_63 = arith.constant 0 : index
      %c0_64 = arith.constant 0 : index
      %157 = vector.load %arg15[%156, %c0_63, %c0_64] : memref<4x4x8xbf16, #tpu.memory_space<vmem>>, vector<1x4x8xbf16>
      %158 = vector.shape_cast %157 : vector<1x4x8xbf16> to vector<4x8xbf16>
      %159 = arith.index_cast %arg17 : i32 to index
      %c0_65 = arith.constant 0 : index
      %c0_66 = arith.constant 0 : index
      %160 = vector.load %arg16[%159, %c0_65, %c0_66] : memref<4x4x8xbf16, #tpu.memory_space<vmem>>, vector<1x4x8xbf16>
      %161 = vector.shape_cast %160 : vector<1x4x8xbf16> to vector<4x8xbf16>
      %162 = arith.truncf %155 : vector<4x8xf32> to vector<4x8xbf16>
      %cst_67 = arith.constant dense<0.000000e+00> : vector<4x4xf32>
      %163 = tpu.matmul %162, %158, %cst_67 {dimension_numbers = #tpu.dot_dimension_numbers<[1], [1], [0], [0], [0, 0, 1, 0], [], []>} : vector<4x8xbf16>, vector<4x8xbf16>, vector<4x4xf32> -> vector<4x4xf32>
      %cst_68 = arith.constant 0.353553385 : f32
      %164 = vector.broadcast %cst_68 : f32 to vector<4x4xf32>
      %165 = arith.mulf %163, %164 : vector<4x4xf32>
      %cst_69 = arith.constant dense<0xFF800000> : vector<4xf32>
      %166 = vector.multi_reduction <maximumf>, %165, %cst_69 [1] : vector<4x4xf32> to vector<4xf32>
      %167 = vector.shape_cast %166 : vector<4xf32> to vector<4x1xf32>
      %168 = vector.broadcast %167 : vector<4x1xf32> to vector<4x4xf32>
      %169 = arith.subf %165, %168 : vector<4x4xf32>
      %170 = math.exp %169 : vector<4x4xf32>
      %cst_70 = arith.constant dense<0.000000e+00> : vector<4xf32>
      %171 = vector.multi_reduction <add>, %170, %cst_70 [1] : vector<4x4xf32> to vector<4xf32>
      %172 = vector.shape_cast %171 : vector<4xf32> to vector<4x1xf32>
      %173 = tpu.reciprocal %172 {approx = true} : vector<4x1xf32> -> vector<4x1xf32>
      %174 = vector.broadcast %173 : vector<4x1xf32> to vector<4x4xf32>
      %175 = arith.mulf %170, %174 : vector<4x4xf32>
      %176 = arith.truncf %175 : vector<4x4xf32> to vector<4x4xbf16>
      %cst_71 = arith.constant dense<0.000000e+00> : vector<4x8xf32>
      %177 = tpu.matmul %176, %161, %cst_71 {dimension_numbers = #tpu.dot_dimension_numbers<[1], [0], [0], [1], [0, 0, 1, 1], [], []>} : vector<4x4xbf16>, vector<4x8xbf16>, vector<4x8xf32> -> vector<4x8xf32>
      %178 = arith.truncf %177 : vector<4x8xf32> to vector<4x8xbf16>
      %179 = arith.index_cast %arg17 : i32 to index
      %c0_72 = arith.constant 0 : index
      %c0_73 = arith.constant 0 : index
      %180 = vector.load %arg7[%179, %c0_72, %c0_73] : memref<4x8x32xbf16, #tpu.memory_space<vmem>>, vector<1x8x32xbf16>
      %181 = vector.shape_cast %180 : vector<1x8x32xbf16> to vector<8x32xbf16>
      %cst_74 = arith.constant dense<0.000000e+00> : vector<4x32xf32>
      %182 = tpu.matmul %178, %181, %cst_74 {dimension_numbers = #tpu.dot_dimension_numbers<[1], [0], [0], [1], [0, 0, 1, 1], [], []>} : vector<4x8xbf16>, vector<8x32xbf16>, vector<4x32xf32> -> vector<4x32xf32>
      %183 = arith.addf %arg18, %182 : vector<4x32xf32>
      scf.yield %183 : vector<4x32xf32>
    }
    %c4_i32_11 = arith.constant 4 : i32
    %c0_12 = arith.constant 0 : index
    %c0_13 = arith.constant 0 : index
    %34 = vector.load %arg8[%c0_12, %c0_13] : memref<1x32xf32, #tpu.memory_space<vmem>>, vector<1x32xf32>
    %cst_14 = arith.constant dense<0.000000e+00> : vector<4xf32>
    %35 = vector.multi_reduction <add>, %33, %cst_14 [1] : vector<4x32xf32> to vector<4xf32>
    %36 = vector.shape_cast %35 : vector<4xf32> to vector<4x1xf32>
    %cst_15 = arith.constant 3.200000e+01 : f32
    %37 = vector.broadcast %cst_15 : f32 to vector<4x1xf32>
    %38 = arith.divf %36, %37 : vector<4x1xf32>
    %39 = vector.broadcast %38 : vector<4x1xf32> to vector<4x32xf32>
    %40 = arith.subf %33, %39 : vector<4x32xf32>
    %41 = arith.mulf %40, %40 : vector<4x32xf32>
    %cst_16 = arith.constant dense<0.000000e+00> : vector<4xf32>
    %42 = vector.multi_reduction <add>, %41, %cst_16 [1] : vector<4x32xf32> to vector<4xf32>
    %43 = vector.shape_cast %42 : vector<4xf32> to vector<4x1xf32>
    %cst_17 = arith.constant 3.200000e+01 : f32
    %44 = vector.broadcast %cst_17 : f32 to vector<4x1xf32>
    %45 = arith.divf %43, %44 : vector<4x1xf32>
    %46 = vector.broadcast %38 : vector<4x1xf32> to vector<4x32xf32>
    %47 = arith.subf %33, %46 : vector<4x32xf32>
    %cst_18 = arith.constant 9.99999974E-6 : f32
    %48 = vector.broadcast %cst_18 : f32 to vector<4x1xf32>
    %49 = arith.addf %45, %48 : vector<4x1xf32>
    %50 = math.rsqrt %49 : vector<4x1xf32>
    %51 = vector.broadcast %50 : vector<4x1xf32> to vector<4x32xf32>
    %52 = arith.mulf %47, %51 : vector<4x32xf32>
    %53 = vector.broadcast %34 : vector<1x32xf32> to vector<4x32xf32>
    %54 = arith.mulf %52, %53 : vector<4x32xf32>
    %55 = arith.addf %8, %54 : vector<4x32xf32>
    %c0_19 = arith.constant 0 : index
    %c0_20 = arith.constant 0 : index
    %56 = vector.load %arg9[%c0_19, %c0_20] : memref<1x32xf32, #tpu.memory_space<vmem>>, vector<1x32xf32>
    %cst_21 = arith.constant dense<0.000000e+00> : vector<4xf32>
    %57 = vector.multi_reduction <add>, %55, %cst_21 [1] : vector<4x32xf32> to vector<4xf32>
    %58 = vector.shape_cast %57 : vector<4xf32> to vector<4x1xf32>
    %cst_22 = arith.constant 3.200000e+01 : f32
    %59 = vector.broadcast %cst_22 : f32 to vector<4x1xf32>
    %60 = arith.divf %58, %59 : vector<4x1xf32>
    %61 = vector.broadcast %60 : vector<4x1xf32> to vector<4x32xf32>
    %62 = arith.subf %55, %61 : vector<4x32xf32>
    %63 = arith.mulf %62, %62 : vector<4x32xf32>
    %cst_23 = arith.constant dense<0.000000e+00> : vector<4xf32>
    %64 = vector.multi_reduction <add>, %63, %cst_23 [1] : vector<4x32xf32> to vector<4xf32>
    %65 = vector.shape_cast %64 : vector<4xf32> to vector<4x1xf32>
    %cst_24 = arith.constant 3.200000e+01 : f32
    %66 = vector.broadcast %cst_24 : f32 to vector<4x1xf32>
    %67 = arith.divf %65, %66 : vector<4x1xf32>
    %68 = vector.broadcast %60 : vector<4x1xf32> to vector<4x32xf32>
    %69 = arith.subf %55, %68 : vector<4x32xf32>
    %cst_25 = arith.constant 9.99999974E-6 : f32
    %70 = vector.broadcast %cst_25 : f32 to vector<4x1xf32>
    %71 = arith.addf %67, %70 : vector<4x1xf32>
    %72 = math.rsqrt %71 : vector<4x1xf32>
    %73 = vector.broadcast %72 : vector<4x1xf32> to vector<4x32xf32>
    %74 = arith.mulf %69, %73 : vector<4x32xf32>
    %75 = vector.broadcast %56 : vector<1x32xf32> to vector<4x32xf32>
    %76 = arith.mulf %74, %75 : vector<4x32xf32>
    %77 = arith.truncf %76 : vector<4x32xf32> to vector<4x32xbf16>
    %c0_26 = arith.constant 0 : index
    %c0_27 = arith.constant 0 : index
    %78 = vector.load %arg10[%c0_26, %c0_27] : memref<32x128xbf16, #tpu.memory_space<vmem>>, vector<32x128xbf16>
    %cst_28 = arith.constant dense<0.000000e+00> : vector<4x128xf32>
    %79 = tpu.matmul %77, %78, %cst_28 {dimension_numbers = #tpu.dot_dimension_numbers<[1], [0], [0], [1], [0, 0, 1, 1], [], []>} : vector<4x32xbf16>, vector<32x128xbf16>, vector<4x128xf32> -> vector<4x128xf32>
    %c0_29 = arith.constant 0 : index
    %c0_30 = arith.constant 0 : index
    %80 = vector.load %arg11[%c0_29, %c0_30] : memref<32x128xbf16, #tpu.memory_space<vmem>>, vector<32x128xbf16>
    %cst_31 = arith.constant dense<0.000000e+00> : vector<4x128xf32>
    %81 = tpu.matmul %77, %80, %cst_31 {dimension_numbers = #tpu.dot_dimension_numbers<[1], [0], [0], [1], [0, 0, 1, 1], [], []>} : vector<4x32xbf16>, vector<32x128xbf16>, vector<4x128xf32> -> vector<4x128xf32>
    %cst_32 = arith.constant 0.707106769 : f32
    %82 = vector.broadcast %cst_32 : f32 to vector<4x128xf32>
    %83 = arith.mulf %81, %82 : vector<4x128xf32>
    %84 = math.absf %83 : vector<4x128xf32>
    %cst_33 = arith.constant 0.327591091 : f32
    %85 = vector.broadcast %cst_33 : f32 to vector<4x128xf32>
    %86 = arith.mulf %85, %84 : vector<4x128xf32>
    %cst_34 = arith.constant 1.000000e+00 : f32
    %87 = vector.broadcast %cst_34 : f32 to vector<4x128xf32>
    %88 = arith.addf %87, %86 : vector<4x128xf32>
    %cst_35 = arith.constant 1.000000e+00 : f32
    %89 = vector.broadcast %cst_35 : f32 to vector<4x128xf32>
    %90 = arith.divf %89, %88 : vector<4x128xf32>
    %cst_36 = arith.constant 1.06140542 : f32
    %91 = vector.broadcast %cst_36 : f32 to vector<4x128xf32>
    %92 = arith.mulf %90, %91 : vector<4x128xf32>
    %cst_37 = arith.constant -1.45315206 : f32
    %93 = vector.broadcast %cst_37 : f32 to vector<4x128xf32>
    %94 = arith.addf %93, %92 : vector<4x128xf32>
    %95 = arith.mulf %90, %94 : vector<4x128xf32>
    %cst_38 = arith.constant 1.42141378 : f32
    %96 = vector.broadcast %cst_38 : f32 to vector<4x128xf32>
    %97 = arith.addf %96, %95 : vector<4x128xf32>
    %98 = arith.mulf %90, %97 : vector<4x128xf32>
    %cst_39 = arith.constant -0.284496725 : f32
    %99 = vector.broadcast %cst_39 : f32 to vector<4x128xf32>
    %100 = arith.addf %99, %98 : vector<4x128xf32>
    %101 = arith.mulf %90, %100 : vector<4x128xf32>
    %cst_40 = arith.constant 0.254829586 : f32
    %102 = vector.broadcast %cst_40 : f32 to vector<4x128xf32>
    %103 = arith.addf %102, %101 : vector<4x128xf32>
    %104 = arith.mulf %90, %103 : vector<4x128xf32>
    %cst_41 = arith.constant 0.000000e+00 : f32
    %105 = vector.broadcast %cst_41 : f32 to vector<4x128xf32>
    %106 = arith.subf %105, %84 : vector<4x128xf32>
    %107 = arith.mulf %106, %84 : vector<4x128xf32>
    %108 = math.exp %107 : vector<4x128xf32>
    %109 = arith.mulf %104, %108 : vector<4x128xf32>
    %cst_42 = arith.constant 1.000000e+00 : f32
    %110 = vector.broadcast %cst_42 : f32 to vector<4x128xf32>
    %111 = arith.subf %110, %109 : vector<4x128xf32>
    %cst_43 = arith.constant 0.000000e+00 : f32
    %112 = vector.broadcast %cst_43 : f32 to vector<4x128xf32>
    %113 = arith.cmpf oge, %83, %112 : vector<4x128xf32>
    %cst_44 = arith.constant 0.000000e+00 : f32
    %114 = vector.broadcast %cst_44 : f32 to vector<4x128xf32>
    %115 = arith.subf %114, %111 : vector<4x128xf32>
    %116 = arith.select %113, %111, %115 : vector<4x128xi1>, vector<4x128xf32>
    %cst_45 = arith.constant 5.000000e-01 : f32
    %117 = vector.broadcast %cst_45 : f32 to vector<4x128xf32>
    %118 = arith.mulf %117, %81 : vector<4x128xf32>
    %cst_46 = arith.constant 1.000000e+00 : f32
    %119 = vector.broadcast %cst_46 : f32 to vector<4x128xf32>
    %120 = arith.addf %119, %116 : vector<4x128xf32>
    %121 = arith.mulf %118, %120 : vector<4x128xf32>
    %122 = arith.mulf %79, %121 : vector<4x128xf32>
    %c0_47 = arith.constant 0 : index
    %c0_48 = arith.constant 0 : index
    %123 = vector.load %arg12[%c0_47, %c0_48] : memref<1x128xf32, #tpu.memory_space<vmem>>, vector<1x128xf32>
    %cst_49 = arith.constant dense<0.000000e+00> : vector<4xf32>
    %124 = vector.multi_reduction <add>, %122, %cst_49 [1] : vector<4x128xf32> to vector<4xf32>
    %125 = vector.shape_cast %124 : vector<4xf32> to vector<4x1xf32>
    %cst_50 = arith.constant 1.280000e+02 : f32
    %126 = vector.broadcast %cst_50 : f32 to vector<4x1xf32>
    %127 = arith.divf %125, %126 : vector<4x1xf32>
    %128 = vector.broadcast %127 : vector<4x1xf32> to vector<4x128xf32>
    %129 = arith.subf %122, %128 : vector<4x128xf32>
    %130 = arith.mulf %129, %129 : vector<4x128xf32>
    %cst_51 = arith.constant dense<0.000000e+00> : vector<4xf32>
    %131 = vector.multi_reduction <add>, %130, %cst_51 [1] : vector<4x128xf32> to vector<4xf32>
    %132 = vector.shape_cast %131 : vector<4xf32> to vector<4x1xf32>
    %cst_52 = arith.constant 1.280000e+02 : f32
    %133 = vector.broadcast %cst_52 : f32 to vector<4x1xf32>
    %134 = arith.divf %132, %133 : vector<4x1xf32>
    %135 = vector.broadcast %127 : vector<4x1xf32> to vector<4x128xf32>
    %136 = arith.subf %122, %135 : vector<4x128xf32>
    %cst_53 = arith.constant 9.99999974E-6 : f32
    %137 = vector.broadcast %cst_53 : f32 to vector<4x1xf32>
    %138 = arith.addf %134, %137 : vector<4x1xf32>
    %139 = math.rsqrt %138 : vector<4x1xf32>
    %140 = vector.broadcast %139 : vector<4x1xf32> to vector<4x128xf32>
    %141 = arith.mulf %136, %140 : vector<4x128xf32>
    %142 = vector.broadcast %123 : vector<1x128xf32> to vector<4x128xf32>
    %143 = arith.mulf %141, %142 : vector<4x128xf32>
    %144 = arith.truncf %143 : vector<4x128xf32> to vector<4x128xbf16>
    %c0_54 = arith.constant 0 : index
    %c0_55 = arith.constant 0 : index
    %145 = vector.load %arg13[%c0_54, %c0_55] : memref<128x32xbf16, #tpu.memory_space<vmem>>, vector<128x32xbf16>
    %cst_56 = arith.constant dense<0.000000e+00> : vector<4x32xf32>
    %146 = tpu.matmul %144, %145, %cst_56 {dimension_numbers = #tpu.dot_dimension_numbers<[1], [0], [0], [1], [0, 0, 1, 1], [], []>} : vector<4x128xbf16>, vector<128x32xbf16>, vector<4x32xf32> -> vector<4x32xf32>
    %147 = arith.addf %55, %146 : vector<4x32xf32>
    %148 = arith.truncf %147 : vector<4x32xf32> to vector<4x32xbf16>
    %c0_57 = arith.constant 0 : index
    %c0_58 = arith.constant 0 : index
    %c0_59 = arith.constant 0 : index
    %149 = vector.load %arg14[%c0_57, %c0_58, %c0_59] : memref<1x4x32xbf16, #tpu.memory_space<vmem>>, vector<1x4x32xbf16>
    %150 = vector.shape_cast %149 : vector<1x4x32xbf16> to vector<4x32xbf16>
    %151 = vector.shape_cast %148 : vector<4x32xbf16> to vector<1x4x32xbf16>
    tpu.vector_store %arg14[%c0_57, %c0_58, %c0_59], %151 {strides = array<i32>} : memref<1x4x32xbf16, #tpu.memory_space<vmem>>, vector<1x4x32xbf16>,
    return
  }
  func.func @transform_0(%arg0: i32, %arg1: i32) -> (i32, i32, i32) {
    %c0_i32 = arith.constant 0 : i32
    %c0_i32_0 = arith.constant 0 : i32
    %c0_i32_1 = arith.constant 0 : i32
    return %arg0, %c0_i32, %c0_i32_0 : i32, i32, i32
  }
  func.func @transform_1(%arg0: i32, %arg1: i32) -> (i32, i32) {
    %c0_i32 = arith.constant 0 : i32
    %c0_i32_0 = arith.constant 0 : i32
    %c0_i32_1 = arith.constant 0 : i32
    return %c0_i32, %c0_i32_0 : i32, i32
  }
  func.func @transform_2(%arg0: i32, %arg1: i32) -> (i32, i32, i32) {
    %c0_i32 = arith.constant 0 : i32
    %c0_i32_0 = arith.constant 0 : i32
    %c0_i32_1 = arith.constant 0 : i32
    %c0_i32_2 = arith.constant 0 : i32
    return %c0_i32, %c0_i32_0, %c0_i32_1 : i32, i32, i32
  }
  func.func @transform_3(%arg0: i32, %arg1: i32) -> (i32, i32, i32) {
    %c0_i32 = arith.constant 0 : i32
    %c0_i32_0 = arith.constant 0 : i32
    %c0_i32_1 = arith.constant 0 : i32
    %c0_i32_2 = arith.constant 0 : i32
    return %c0_i32, %c0_i32_0, %c0_i32_1 : i32, i32, i32
  }
  func.func @transform_4(%arg0: i32, %arg1: i32) -> (i32, i32, i32) {
    %c0_i32 = arith.constant 0 : i32
    %c0_i32_0 = arith.constant 0 : i32
    %c0_i32_1 = arith.constant 0 : i32
    %c0_i32_2 = arith.constant 0 : i32
    return %c0_i32, %c0_i32_0, %c0_i32_1 : i32, i32, i32
  }
  func.func @transform_5(%arg0: i32, %arg1: i32) -> (i32, i32, i32) {
    %c0_i32 = arith.constant 0 : i32
    %c0_i32_0 = arith.constant 0 : i32
    %c0_i32_1 = arith.constant 0 : i32
    %c0_i32_2 = arith.constant 0 : i32
    return %c0_i32, %c0_i32_0, %c0_i32_1 : i32, i32, i32
  }
  func.func @transform_6(%arg0: i32, %arg1: i32) -> (i32, i32) {
    %c0_i32 = arith.constant 0 : i32
    %c0_i32_0 = arith.constant 0 : i32
    %c0_i32_1 = arith.constant 0 : i32
    return %c0_i32, %c0_i32_0 : i32, i32
  }
  func.func @transform_7(%arg0: i32, %arg1: i32) -> (i32, i32) {
    %c0_i32 = arith.constant 0 : i32
    %c0_i32_0 = arith.constant 0 : i32
    %c0_i32_1 = arith.constant 0 : i32
    return %c0_i32, %c0_i32_0 : i32, i32
  }
  func.func @transform_8(%arg0: i32, %arg1: i32) -> (i32, i32) {
    %c0_i32 = arith.constant 0 : i32
    %c0_i32_0 = arith.constant 0 : i32
    %c0_i32_1 = arith.constant 0 : i32
    return %c0_i32, %c0_i32_0 : i32, i32
  }
  func.func @transform_9(%arg0: i32, %arg1: i32) -> (i32, i32) {
    %c0_i32 = arith.constant 0 : i32
    %c0_i32_0 = arith.constant 0 : i32
    %c0_i32_1 = arith.constant 0 : i32
    return %c0_i32, %c0_i32_0 : i32, i32
  }
  func.func @transform_10(%arg0: i32, %arg1: i32) -> (i32, i32) {
    %c0_i32 = arith.constant 0 : i32
    %c0_i32_0 = arith.constant 0 : i32
    %c0_i32_1 = arith.constant 0 : i32
    return %c0_i32, %c0_i32_0 : i32, i32
  }
  func.func @transform_11(%arg0: i32, %arg1: i32) -> (i32, i32) {
    %c0_i32 = arith.constant 0 : i32
    %c0_i32_0 = arith.constant 0 : i32
    %c0_i32_1 = arith.constant 0 : i32
    return %c0_i32, %c0_i32_0 : i32, i32
  }
  func.func @transform_12(%arg0: i32, %arg1: i32) -> (i32, i32, i32) {
    %c0_i32 = arith.constant 0 : i32
    %c0_i32_0 = arith.constant 0 : i32
    return %arg0, %arg1, %c0_i32 : i32, i32, i32
  }
}

</mosaic_0001>

<bundles_post_ra>
// kernel: vit_forward.7
= control target key start
LH: loop header
LB: loop body
LE: loop exit
PB: predicated region body
PF: predicated region fallthrough
CT: control target
= control target key end

     0   :  { %s415_s12 = smov 0   ;;  %s454_s0 = inlined_call_operand.vmem [shape: bf16[2,4,32], index: 0, kind: input, shape index: {}]   ;;  %s455_s1 = inlined_call_operand.vmem [shape: f32[1,32], index: 1, kind: input, shape index: {}]   ;;  %s456_s2 = inlined_call_operand.vmem [shape: f32[32,32], index: 2, kind: input, shape index: {}]   ;;  %s457_s3 = inlined_call_operand.vmem [shape: f32[2,5,32], index: 3, kind: output, shape index: {}]  }
   0x1 LB: > { %s338_s13 = sadd.s32 4294967295, %s390_s12   ;;  %p342_p0 = scmp.ge.s32.totalorder %s390_s12, 1  ;;  %s390_s12 = sphi %s415_s12, %s13_s12  }
   0x2   : > { %p136_p1 = scmp.lt.s32.totalorder %s390_s12, 3 }
   0x4   : > { %p137_p2 = pnand %p342_p0, %p136_p1 }
   0x5   : > { %p158_p3 = scmp.lt.s32.totalorder (!%p137_p2), %s338_s13, 1  ;;  %vm169_vm0 = vcmask (!%p137_p2), 257024   ;;  %v200_v8 = vld [vmem:[%s456_s2] sm:$0xff] (!%p137_p2)  ;;  %v201_v9 = vld [vmem:[%s456_s2 + $0x8] sm:$0xff] (!%p137_p2)  ;;  %v202_v10 = vld [vmem:[%s456_s2 + $0x10] sm:$0xff] (!%p137_p2)  ;;  %v392_v11 = vmov (!%p137_p2), 0.0|0.0  }
   0x6   : > { %140 = sbr.rel (%p137_p2) target bundleno = 559 (0x22f), region = 32  ;;  %365 = vmatprep.subr.bf16.mxu0 (!%p137_p2), %v392_v11  ;;  %v366_v12 = vpack.c.bf16 (!%p137_p2), %v201_v9, %v200_v8  ;;  %v203_v13 = vld [vmem:[%s456_s2 + $0x18] sm:$0xff] (!%p137_p2)  ;;  %vm393_vm1 = vmmov (!%p137_p2), 0   ;;  %v394_v14 = vmov (!%p137_p2), 0.0   ;;  %v345_v20 = vld [vmem:[%s455_s1] ss:$0 sm:$0xff] (!%p137_p2) }
   0x7   : > { %362 = vmatprep.mubr.msk.f32.mxu0 (!%p137_p2), %vm393_vm1, %v394_v14  ;;  %v369_v15 = vpack.c.bf16 (!%p137_p2), %v203_v13, %v202_v10  ;;  %vm204_vm2 = vcmask (!%p137_p2), 261120   ;;  %vm281_vm3 = vcmask (!%p137_p2), 1040384   ;;  %vm283_vm4 = vcmask (!%p137_p2), 258048  }
   0x8   : > { %367 = vmatpush3.bf16.msra.mxu0 (!%p137_p2), %v366_v12 }
   0x9   : > { %368 = vmatprep.subr.bf16.mxu0 (!%p137_p2), %v392_v11 }
   0xc   : > { %370 = vmatpush3.bf16.msra.mxu0 (!%p137_p2), %v369_v15 }
   0xd   : > { %s459_s13 = smov (!%p158_p3, %s338_s13), 1 }
   0xe   : > { %s343_s14 = sshll.u32 %s459_s13, 1  ;;  %s344_s28 = sshll.u32 %s459_s13, 3 }
   0xf   : > { %s161_s17 = scalar_lea.vmem %s454_s0, %s343_s14  ;;  %s165_s4 = scalar_lea.vmem %s457_s3, %s344_s28 }
  0x10   : > { %v166_v0 = vld [vmem:[%s161_s17] sm:$0x3] }
  0x11   : > { %v167_v1 = vunpack.c.l.bf16 %v166_v0 }
  0x13   : > { %v170_v2 = vsel %vm169_vm0, %v167_v1, 0.0 }
  0x14   : > { %171 = vadd.xlane.f32.xlu0 %v170_v2 }
  0xa1   : > { %v172_v3 = vpop.xlane.xlu0 %171 }
  0xa2   : > { %v174_v4 = vmul.f32 0.03125, %v172_v3 }
  0xa4   : > { %v175_v5 = vsub.f32 %v167_v1, %v174_v4 }
  0xa6   : > { %v176_v6 = vmul.f32 %v175_v5, %v175_v5 }
  0xa8   : > { %v177_v7 = vsel %vm169_vm0, %v176_v6, 0.0 }
  0xa9   : > { %178 = vadd.xlane.f32.xlu0 %v177_v7 }
 0x136   : > { %v179_v16 = vpop.xlane.xlu0 %178 }
 0x137   : > { %v180_v17 = vmul.f32 0.03125, %v179_v16 }
 0x139   : > { %v181_v18 = vadd.f32 1e-05, %v180_v17 }
 0x13b   : > { %382 = vrsqrt.f32 %v181_v18 }
 0x145   : > { %v383_v19 = vpop.eup %382 }
 0x146   : > { %v183_v21 = vmul.f32 %v383_v19, %v175_v5 }
 0x148   : > { %v190_v22 = vmul.f32 %v345_v20, %v183_v21 }
 0x14a   : > { %v191_v23 = vsel %vm169_vm0, %v190_v22, 0.0  ;;  %v279_v31 = vrot.slane %v190_v22, 7 }
 0x14b   : > { %v192_v24 = vrot.slane %v191_v23, 4 }
 0x14d   : > { %v193_v25 = vadd.f32 %v192_v24, %v191_v23 }
 0x14f   : > { %v194_v26 = vrot.slane %v193_v25, 2 }
 0x151   : > { %v195_v27 = vadd.f32 %v194_v26, %v193_v25 }
 0x153   : > { %v196_v28 = vrot.slane %v195_v27, 1 }
 0x155   : > { %v197_v29 = vadd.f32 %v196_v28, %v195_v27 }
 0x157   : > { %v199_v30 = vmul.f32 0.25, %v197_v29 }
 0x159   : > { %363 = vmatmul.mubr.msk.f32.vlgmr.msra.gmra.mrb[0].mxu0 %vm204_vm2, %v199_v30 }
 0x22c   : > { %v274_v32 = vpop.f32.mrb[0].mxu0 }
 0x22d   : > { %v282_v33 = vsel %vm281_vm3, %v274_v32, %v279_v31  ;;  %v364_v34 = vpop.f32.mrb[1].mxu0 }
 0x22e   : > { %284 = vst.msk [vmem:[%s165_s4] sm:$0x1f] %vm283_vm4, %v282_v33 }
 0x22f PF: > { %s13_s12 = sadd.s32 1, %s390_s12  }
 0x230   : > { %p10_p4 = scmp.ge.s32.totalorder %s13_s12, 4  }
 0x232   :  { %12 = sbr.rel (!%p10_p4) target bundleno = 1 (0x1), region = 62 }

// kernel: vit_forward.4
= control target key start
LH: loop header
LB: loop body
LE: loop exit
PB: predicated region body
PF: predicated region fallthrough
CT: control target
= control target key end

     0   :  { %vm58_vm0 = vcmask 1043456   ;;  %vm212_vm1 = vcmask 261120   ;;  %vm235_vm2 = vcmask 257024   ;;  %s396_s1 = inlined_call_operand.vmem [shape: bf16[256,32], index: 1, kind: input, shape index: {}]   ;;  %s397_s0 = inlined_call_operand.vmem [shape: bf16[8,256], index: 0, kind: input, shape index: {}]   ;;  %s398_s3 = inlined_call_operand.vmem [shape: f32[4,32], index: 3, kind: input, shape index: {}]   ;;  %s399_s2 = inlined_call_operand.vmem [shape: f32[1,32], index: 2, kind: input, shape index: {}]   ;;  %s400_s4 = inlined_call_operand.vmem [shape: f32[1,32], index: 4, kind: input, shape index: {}]   ;;  %s401_s5 = inlined_call_operand.vmem [shape: bf16[8,32], index: 5, kind: output, shape index: {}]  }
   0x1   :  { %v283_v0 = vld [vmem:[%s396_s1 + $0x40] sm:$0xff]   ;;  %v285_v2 = vld [vmem:[%s396_s1 + $0x48] sm:$0xff]   ;;  %v287_v4 = vld [vmem:[%s396_s1 + $0x50] sm:$0xff]  }
   0x2   :  { %v284_v1 = vld [vmem:[%s396_s1] sm:$0xff]   ;;  %261 = vmatprep.subr.bf16.mxu0 %v283_v0  ;;  %v286_v3 = vld [vmem:[%s396_s1 + $0x8] sm:$0xff]   ;;  %v288_v5 = vld [vmem:[%s396_s1 + $0x10] sm:$0xff]  }
   0x3   :  { %262 = vmatpush3.bf16.msra.mxu0 %v284_v1  ;;  %v289_v6 = vld [vmem:[%s396_s1 + $0x58] sm:$0xff]   ;;  %v291_v8 = vld [vmem:[%s396_s1 + $0x60] sm:$0xff]   ;;  %v293_v10 = vld [vmem:[%s396_s1 + $0x68] sm:$0xff]  }
   0x4   :  { %263 = vmatprep.subr.bf16.mxu0 %v285_v2  ;;  %v290_v7 = vld [vmem:[%s396_s1 + $0x18] sm:$0xff]   ;;  %v292_v9 = vld [vmem:[%s396_s1 + $0x20] sm:$0xff]   ;;  %v294_v13 = vld [vmem:[%s396_s1 + $0x28] sm:$0xff]  }
   0x5   :  { %v21_v11 = vld [vmem:[%s397_s0] sm:$0xff]  ;;  %v295_v14 = vld [vmem:[%s396_s1 + $0x70] sm:$0xff]   ;;  %v297_v16 = vld [vmem:[%s396_s1 + $0x78] sm:$0xff]  }
   0x6   :  { %v243_v12 = vcombine.high %v21_v11, %v21_v11  ;;  %v296_v15 = vld [vmem:[%s396_s1 + $0x30] sm:$0xff]   ;;  %v298_v17 = vld [vmem:[%s396_s1 + $0x38] sm:$0xff]   ;;  %v242_v18 = vcombine.low %v21_v11, %v21_v11  ;;  %v54_v19 = vld [vmem:[%s398_s3] sm:$0xf] }
   0x7   :  { %264 = vmatpush3.bf16.msra.mxu0 %v286_v3  ;;  %v56_v20 = vrot.slane %v54_v19, 4  ;;  %v241_v22 = vld [vmem:[%s399_s2] ss:$0 sm:$0xff] }
   0x8   :  { %265 = vmatprep.subr.bf16.mxu0 %v287_v4  ;;  %202 = vmatprep.mubr.bf16.mxu0 %v243_v12  ;;  %v260_v40 = vld [vmem:[%s400_s4] ss:$0 sm:$0xff] }
   0x9   :  { %v59_v27 = vsel %vm58_vm0, %v54_v19, %v56_v20 }
   0xb   :  { %266 = vmatpush3.bf16.msra.mxu0 %v288_v5 }
   0xc   :  { %267 = vmatprep.subr.bf16.mxu0 %v289_v6 }
   0xf   :  { %268 = vmatpush3.bf16.msra.mxu0 %v290_v7 }
  0x10   :  { %269 = vmatprep.subr.bf16.mxu0 %v291_v8 }
  0x13   :  { %270 = vmatpush3.bf16.msra.mxu0 %v292_v9 }
  0x14   :  { %271 = vmatprep.subr.bf16.mxu0 %v293_v10 }
  0x17   :  { %272 = vmatpush3.bf16.msra.mxu0 %v294_v13 }
  0x18   :  { %273 = vmatprep.subr.bf16.mxu0 %v295_v14 }
  0x1b   :  { %274 = vmatpush3.bf16.msra.mxu0 %v296_v15 }
  0x1c   :  { %275 = vmatprep.subr.bf16.mxu0 %v297_v16 }
  0x1f   :  { %276 = vmatpush3.bf16.msra.mxu0 %v298_v17 }
  0x22   :  { %203 = vmatmul.mubr.bf16.vlgmr.msra.gmra.mrb[0].mxu0 %v242_v18 }
  0xf5   :  { %v277_v21 = vpop.f32.mrb[0].mxu0 }
  0xf6   :  { %v278_v23 = vpop.f32.mrb[1].mxu0 }
  0xf7   :  { %v279_v24 = vadd.f32 %v278_v23, %v277_v21  ;;  %v280_v25 = vpop.f32.mrb[2].mxu0 }
  0xf8   :  { %v281_v26 = vpop.f32.mrb[3].mxu0 }
  0xf9   :  { %v205_v28 = vadd.f32 %v279_v24, %v241_v22 }
  0xfb   :  { %v210_v29 = vadd.f32 %v205_v28, %v59_v27 }
  0xfd   :  { %v213_v30 = vsel %vm212_vm1, %v210_v29, 0.0 }
  0xfe   :  { %214 = vadd.xlane.f32.xlu0 %v213_v30 }
 0x18b   :  { %v215_v31 = vpop.xlane.xlu0 %214 }
 0x18c   :  { %v217_v32 = vmul.f32 0.03125, %v215_v31 }
 0x18e   :  { %v218_v33 = vsub.f32 %v210_v29, %v217_v32 }
 0x190   :  { %v219_v34 = vmul.f32 %v218_v33, %v218_v33 }
 0x192   :  { %v220_v35 = vsel %vm212_vm1, %v219_v34, 0.0 }
 0x193   :  { %221 = vadd.xlane.f32.xlu0 %v220_v35 }
 0x220   :  { %v222_v36 = vpop.xlane.xlu0 %221 }
 0x221   :  { %v223_v37 = vmul.f32 0.03125, %v222_v36 }
 0x223   :  { %v224_v38 = vadd.f32 1e-05, %v223_v37 }
 0x225   :  { %301 = vrsqrt.f32 %v224_v38 }
 0x22f   :  { %v302_v39 = vpop.eup %301 }
 0x230   :  { %v226_v41 = vmul.f32 %v302_v39, %v218_v33 }
 0x232   :  { %v233_v42 = vmul.f32 %v260_v40, %v226_v41 }
 0x234   :  { %v234_v43 = vpack.c.bf16 %v233_v42, %v233_v42 }
 0x236   :  { %236 = vst.msk [vmem:[%s401_s5] sm:$0xf] %vm235_vm2, %v234_v43 }

// kernel: vit_forward.5
= control target key start
LH: loop header
LB: loop body
LE: loop exit
PB: predicated region body
PF: predicated region fallthrough
CT: control target
= control target key end

     0   :  { %s1657_s21 = smov 0   ;;  %s1659_s22 = smov 0   ;;  %s1851_s0 = inlined_call_operand.vmem [shape: bf16[2,4,32], index: 0, kind: input, shape index: {}]   ;;  %s1852_s1 = inlined_call_operand.vmem [shape: f32[1,32], index: 1, kind: input, shape index: {}]   ;;  %s1853_s2 = inlined_call_operand.vmem [shape: bf16[4,32,8], index: 2, kind: input, shape index: {}]   ;;  %s1854_s3 = inlined_call_operand.vmem [shape: bf16[4,32,8], index: 3, kind: input, shape index: {}]   ;;  %s1855_s4 = inlined_call_operand.vmem [shape: bf16[4,32,8], index: 4, kind: input, shape index: {}]   ;;  %s1856_s5 = inlined_call_operand.vmem [shape: bf16[4,8,32], index: 5, kind: input, shape index: {}]   ;;  %s1857_s6 = inlined_call_operand.vmem [shape: f32[1,32], index: 6, kind: input, shape index: {}]   ;;  %s1858_s7 = inlined_call_operand.vmem [shape: f32[1,32], index: 7, kind: input, shape index: {}]   ;;  %s1859_s8 = inlined_call_operand.vmem [shape: bf16[32,128], index: 8, kind: input, shape index: {}]   ;;  %s1860_s9 = inlined_call_operand.vmem [shape: bf16[32,128], index: 9, kind: input, shape index: {}]   ;;  %s1861_s10 = inlined_call_operand.vmem [shape: f32[1,128], index: 10, kind: input, shape index: {}]   ;;  %s1862_s11 = inlined_call_operand.vmem [shape: bf16[128,32], index: 11, kind: input, shape index: {}]   ;;  %s1863_s12 = inlined_call_operand.vmem [shape: bf16[2,4,32], index: 12, kind: output, shape index: {}]  }
   0x1   :  { %s1661_s23 = smov 0  }
   0x2 LB: > { %s34_s24 = sadd.s32 1, %s1568_s22  ;;  %p1291_p0 = scmp.ge.s32.totalorder %s1572_s23, 1  ;;  %s1572_s23 = sphi %s1661_s23, %s22_s23   ;;  %s1568_s22 = sphi %s1659_s22, %s1866_s22   ;;  %s1564_s21 = sphi %s1657_s21, %s1865_s21  }
   0x3   : > { %p36_p1 = scmp.ge.s32.totalorder %s34_s24, 2  ;;  %p375_p2 = scmp.lt.s32.totalorder %s1572_s23, 3 }
   0x5   : > { %s1868_s24 = smov (%p36_p1, %s34_s24), 0  ;;  %p376_p3 = pnand %p1291_p0, %p375_p2 }
   0x6   : > { %p418_p4 = scmp.lt.s32.totalorder (!%p376_p3), %s1564_s21, 1  ;;  %vm437_vm0 = vcmask (!%p376_p3), 257024   ;;  %v1294_v12 = vld [vmem:[%s1852_s1] ss:$0 sm:$0xff] (!%p376_p3)  ;;  %s1691_s16 = smov (!%p376_p3), 0  }
   0x7   : > { %379 = sbr.rel (%p376_p3) target bundleno = 3260 (0xcbc), region = 68 }
   0xe   : > { %s1870_s21 = smov (!%p418_p4, %s1564_s21), 1 }
   0xf   : > { %s1292_s25 = sshll.u32 %s1870_s21, 1 }
  0x10   : > { %s1678_s28 = scalar_lea.vmem %s1851_s0, %s1292_s25  ;;  %s1683_s13 = scalar_lea.vmem %s1863_s12, %s1292_s25 }
  0x11   : > { %v434_v0 = vld [vmem:[%s1678_s28] sm:$0x3] }
  0x12   : > { %v435_v1 = vunpack.c.l.bf16 %v434_v0 }
  0x14   : > { %v438_v2 = vsel %vm437_vm0, %v435_v1, 0.0 }
  0x15   : > { %439 = vadd.xlane.f32.xlu0 %v438_v2 }
  0xa2   : > { %v440_v3 = vpop.xlane.xlu0 %439 }
  0xa3   : > { %v442_v4 = vmul.f32 0.03125, %v440_v3 }
  0xa5   : > { %v443_v5 = vsub.f32 %v435_v1, %v442_v4 }
  0xa7   : > { %v444_v6 = vmul.f32 %v443_v5, %v443_v5 }
  0xa9   : > { %v445_v7 = vsel %vm437_vm0, %v444_v6, 0.0 }
  0xaa   : > { %446 = vadd.xlane.f32.xlu0 %v445_v7 }
 0x137   : > { %v447_v8 = vpop.xlane.xlu0 %446 }
 0x138   : > { %v448_v9 = vmul.f32 0.03125, %v447_v8 }
 0x13a   : > { %v449_v10 = vadd.f32 1e-05, %v448_v9 }
 0x13c   : > { %1502 = vrsqrt.f32 %v449_v10 }
 0x146   : > { %v1503_v11 = vpop.eup %1502 }
 0x147   : > { %v451_v13 = vmul.f32 %v1503_v11, %v443_v5 }
 0x149   : > { %v458_v14 = vmul.f32 %v1294_v12, %v451_v13 }
 0x14b   : > { %v459_v15 = vpack.c.bf16 %v458_v14, %v458_v14 }
 0x14c LB: >> { %v1586_v16 = vmov 0.0   ;;  %s1337_s17 = sshll.u32 %s1576_s16, 4  ;;  %vm1587_vm1 = vmmov 0   ;;  %vm485_vm2 = vcmask 261120   ;;  %s1300_s27 = sshll.u32 %s1576_s16, 1  ;;  %vm532_vm3 = vcmask 58368   ;;  %s1576_s16 = sphi %s1691_s16, %s465_s16  }
 0x14d   : >> { %1370 = vmatprep.subr.bf16.mxu0 %v1586_v16  ;;  %1378 = vmatprep.subr.bf16.mxu1 %v1586_v16  ;;  %s468_s20 = scalar_lea.vmem %s1854_s3, %s1337_s17  ;;  %s535_s26 = scalar_lea.vmem %s1855_s4, %s1337_s17 }
 0x14e   : >> { %1374 = vmatprep.mubr.msk.bf16.mxu0 %vm1587_vm1, %v1586_v16  ;;  %1382 = vmatprep.mubr.msk.bf16.mxu1 %vm1587_vm1, %v1586_v16  ;;  %v1504_v17 = vld [vmem:[%s468_s20] sm:$0xff]   ;;  %v1506_v19 = vld [vmem:[%s468_s20 + $0x8] sm:$0xff]   ;;  %s531_s29 = scalar_lea.vmem [#allocation2], %s1300_s27  ;;  %s594_s30 = scalar_lea.vmem [#allocation3], %s1300_s27 }
 0x14f   : >> { %v1505_v18 = vld [vmem:[%s535_s26] sm:$0xff]   ;;  %1371 = vmatpush3.bf16.msra.mxu0 %v1504_v17  ;;  %v1507_v20 = vld [vmem:[%s535_s26 + $0x8] sm:$0xff]   ;;  %s465_s16 = sadd.s32 1, %s1576_s16  }
 0x150   : >> { %1379 = vmatpush3.bf16.msra.mxu1 %v1505_v18  ;;  %1372 = vmatprep.subr.bf16.mxu0 %v1586_v16  ;;  %p462_p5 = scmp.ge.s32.totalorder %s465_s16, 4  }
 0x151   : >> { %1380 = vmatprep.subr.bf16.mxu1 %v1586_v16  ;;  %v601_v31 = vld [vmem:[%s1678_s28] sm:$0x3] (%p462_p5)  ;;  %v1723_v47 = vmov (%p462_p5), 0.0   ;;  %s1725_s15 = smov (%p462_p5), 0  }
 0x152   : > { %v1710_v32 = vunpack.c.l.bf16 (%p462_p5), %v601_v31  ;;  %v1306_v43 = vld [vmem:[%s1852_s1] ss:$0 sm:$0xff] (%p462_p5) }
 0x153   : >> { %1373 = vmatpush3.bf16.msra.mxu0 %v1506_v19 }
 0x154   : >> { %1381 = vmatpush3.bf16.msra.mxu1 %v1507_v20  ;;  %v605_v33 = vsel (%p462_p5), %vm437_vm0, %v1710_v32, 0.0 }
 0x155   : > { %606 = vadd.xlane.f32.xlu0 (%p462_p5), %v605_v33 }
 0x156   : >> { %1375 = vmatmul.mubr.msk.bf16.vlgmr.msra.gmra.mrb[0].mxu0 %vm485_vm2, %v459_v15 }
 0x157   : >> { %1383 = vmatmul.mubr.msk.bf16.vlgmr.msra.gmra.mrb[0].mxu1 %vm485_vm2, %v459_v15 }
 0x1e2   : > { %v607_v34 = vpop.xlane.xlu0 (%p462_p5), %606 }
 0x1e3   : > { %v609_v35 = vmul.f32 (%p462_p5), 0.03125, %v607_v34 }
 0x1e5   : > { %v610_v36 = vsub.f32 (%p462_p5), %v1710_v32, %v609_v35 }
 0x1e7   : > { %v611_v37 = vmul.f32 (%p462_p5), %v610_v36, %v610_v36 }
 0x1e9   : > { %v612_v38 = vsel (%p462_p5), %vm437_vm0, %v611_v37, 0.0 }
 0x1ea   : > { %613 = vadd.xlane.f32.xlu0 (%p462_p5), %v612_v38 }
 0x227   : > { %464 = sbr.rel (!%p462_p5) target bundleno = 332 (0x14c), region = 125 }
 0x229   : >> { %v523_v21 = vpop.f32.mrb[0].mxu0 }
 0x22a   : >> { %v529_v22 = vpack.c.bf16 %v523_v21, %v523_v21  ;;  %v586_v23 = vpop.f32.mrb[0].mxu1  ;;  %v1376_v24 = vpop.f32.mrb[1].mxu0 }
 0x22b   : >> { %v592_v25 = vpack.c.bf16 %v586_v23, %v586_v23  ;;  %v1384_v26 = vpop.f32.mrb[1].mxu1  ;;  %v526_v27 = vpop.f32.mrb[2].mxu0 }
 0x22c   : >> { %533 = vst.msk [vmem:[%s531_s29] sm:$0x3] %vm532_vm3, %v529_v22  ;;  %v589_v28 = vpop.f32.mrb[2].mxu1  ;;  %v1377_v29 = vpop.f32.mrb[3].mxu0 }
 0x22d   : >> { %595 = vst.msk [vmem:[%s594_s30] sm:$0x3] %vm532_vm3, %v592_v25  ;;  %v1385_v30 = vpop.f32.mrb[3].mxu1 }
 0x277   : > { %v614_v39 = vpop.xlane.xlu0 %613 }
 0x278   : > { %v615_v40 = vmul.f32 0.03125, %v614_v39 }
 0x27a   : > { %v616_v41 = vadd.f32 1e-05, %v615_v40 }
 0x27c   : > { %1508 = vrsqrt.f32 %v616_v41 }
 0x286   : > { %v1509_v42 = vpop.eup %1508 }
 0x287   : > { %v618_v44 = vmul.f32 %v1509_v42, %v610_v36 }
 0x289   : > { %v1719_v45 = vmul.f32 %v1306_v43, %v618_v44 }
 0x28b   : > { %v626_v46 = vpack.c.bf16 %v1719_v45, %v1719_v45 }
 0x28c LB: >> { %v1588_v48 = vmov 0.0   ;;  %vm1589_vm4 = vmmov 0   ;;  %s1339_s16 = sshll.u32 %s1584_s15, 4  ;;  %s1312_s17 = sshll.u32 %s1584_s15, 1  ;;  %vm704_vm5 = vcmask 64512   ;;  %vm752_vm6 = vcmask 27648   ;;  %s1584_s15 = sphi %s1725_s15, %s632_s15   ;;  %v1580_v47 = vphi %v1723_v47, %v1864_v47  }
 0x28d   : >> { %1386 = vmatprep.subr.bf16.mxu0 %v1588_v48  ;;  %1390 = vmatprep.mubr.msk.bf16.mxu0 %vm1589_vm4, %v1588_v48  ;;  %s636_s20 = scalar_lea.vmem %s1853_s2, %s1339_s16  ;;  %s698_s21 = scalar_lea.vmem [#allocation2], %s1312_s17  ;;  %vm769_vm7 = vcmask 1041408   ;;  %vm820_vm8 = vcmask 1043456   ;;  %vm765_vm9 = vcmask 31744  }
 0x28e   : >> { %1394 = vmatprep.subr.bf16.mxu1 %v1588_v48  ;;  %1396 = vmatprep.mubr.msk.bf16.mxu1 %vm1589_vm4, %v1588_v48  ;;  %v1510_v49 = vld [vmem:[%s636_s20] sm:$0xff]   ;;  %v1511_v50 = vld [vmem:[%s636_s20 + $0x8] sm:$0xff]   ;;  %s701_s25 = scalar_lea.vmem [#allocation3], %s1312_s17  ;;  %s1316_s26 = sshll.u32 %s1584_s15, 2 }
 0x28f   : >> { %1387 = vmatpush3.bf16.msra.mxu0 %v1510_v49  ;;  %v699_v51 = vld [vmem:[%s698_s21] sm:$0x3]  ;;  %s815_s30 = scalar_lea.vmem %s1856_s5, %s1316_s26  ;;  %s632_s15 = sadd.s32 1, %s1584_s15  }
 0x290   : >> { %1388 = vmatprep.subr.bf16.mxu0 %v1588_v48  ;;  %v709_v52 = vsel %vm704_vm5, %v699_v51, 0  ;;  %v702_v5 = vld [vmem:[%s701_s25] sm:$0x3]  ;;  %p629_p6 = scmp.ge.s32.totalorder %s632_s15, 4  }
 0x291   : >> { %1395 = vmatpush3.bf16.xpose.msra.mxu1 %v709_v52  ;;  %v771_v6 = vsel %vm769_vm7, %v702_v5, 0  ;;  %v816_v7 = vld [vmem:[%s815_s30] sm:$0xf]  ;;  %v1590_v45 = vmov (%p629_p6), 0.0   ;;  %vm1591_vm10 = vmmov (%p629_p6), 0   ;;  %vm1183_vm12 = vcmask (%p629_p6), 254976  }
 0x292   : >> { %1406 = vmatprep.subr.bf16.mxu1 %v1588_v48  ;;  %v822_v8 = vsel %vm820_vm8, %v816_v7, 0  ;;  %v1318_v34 = vld [vmem:[%s1857_s6] ss:$0 sm:$0xff] (%p629_p6) }
 0x293   : >> { %1389 = vmatpush3.bf16.msra.mxu0 %v1511_v50  ;;  %v1516_v44 = vld [vmem:[%s1859_s8] sm:$0xff] (%p629_p6)  }
 0x294   : >> { %1400 = vmatprep.subr.bf16.mxu0 %v1588_v48  ;;  %v1319_v50 = vld [vmem:[%s1858_s7] ss:$0 sm:$0xff] (%p629_p6) }
 0x296   : >> { %1391 = vmatmul.mubr.msk.bf16.vlgmr.msra.gmra.mrb[0].mxu0 %vm485_vm2, %v626_v46 }
 0x297   : >> { %1402 = vmatprep.mubr.msk.bf16.mxu0 %vm1589_vm4, %v1588_v48  ;;  %1401 = vmatpush3.bf16.msra.mxu0 %v771_v6 }
 0x298   : > { %1428 = vmatprep.subr.bf16.mxu0 (%p629_p6), %v1590_v45 }
 0x369   : >> { %v691_v53 = vpop.f32.mrb[0].mxu0 }
 0x36a   : >> { %v703_v54 = vpack.c.bf16 %v691_v53, %v691_v53  ;;  %v1392_v55 = vpop.f32.mrb[1].mxu0  ;;  %v1518_v53 = vld [vmem:[%s1860_s9] sm:$0xff] (%p629_p6)  }
 0x36b   : >> { %v694_v56 = vpop.f32.mrb[2].mxu0  ;;  %v1519_v55 = vld [vmem:[%s1860_s9 + $0x8] sm:$0xff] (%p629_p6)  }
 0x36c   : >> { %v1393_v57 = vpop.f32.mrb[3].mxu0  ;;  %1397 = vmatmul.mubr.msk.bf16.vlgmr.msra.gmra.mrb[0].mxu1 %vm704_vm5, %v703_v54 }
 0x36d   : >> { %1408 = vmatprep.mubr.msk.bf16.mxu1 %vm1589_vm4, %v1588_v48  ;;  %1407 = vmatpush3.bf16.msra.mxu1 %v822_v8 }
 0x36e   : > { %1412 = vmatprep.subr.bf16.mxu1 (%p629_p6), %v1590_v45 }
 0x43f   : >> { %v745_v58 = vpop.f32.mrb[0].mxu1 }
 0x440   : >> { %v751_v59 = vmul.f32 0.35355338, %v745_v58  ;;  %v1398_v60 = vpop.f32.mrb[1].mxu1 }
 0x441   : >> { %v748_v61 = vpop.f32.mrb[2].mxu1 }
 0x442   : >> { %v1399_v62 = vpop.f32.mrb[3].mxu1  ;;  %v753_v63 = vsel %vm752_vm6, %v751_v59, -inf }
 0x443   : >> { %754 = vmax.xlane.f32.xlu0 %v753_v63 }
 0x4d0   : >> { %v755_v0 = vpop.xlane.xlu0 %754 }
 0x4d1   : >> { %v756_v1 = vsub.f32 %v751_v59, %v755_v0 }
 0x4d3   : >> { %v757_v2 = vmul.f32 1.442695, %v756_v1 }
 0x4d5   : >> { %1512 = vpow2.f32 %v757_v2 }
 0x4df   : >> { %v1513_v3 = vpop.eup %1512 }
 0x4e0   : >> { %v759_v4 = vsel %vm752_vm6, %v1513_v3, 0.0 }
 0x4e1   : >> { %760 = vadd.xlane.f32.xlu0 %v759_v4 }
 0x56e   : >> { %v761_v9 = vpop.xlane.xlu0 %760 }
 0x56f   : >> { %1514 = vrcp.f32 %v761_v9 }
 0x579   : >> { %v1515_v10 = vpop.eup %1514 }
 0x57a   : >> { %v763_v11 = vmul.f32 %v1515_v10, %v1513_v3 }
 0x57c   : >> { %v764_v12 = vpack.c.bf16 %v763_v11, %v763_v11 }
 0x57e   : >> { %1403 = vmatmul.mubr.msk.bf16.vlgmr.msra.gmra.mrb[4].mxu0 %vm765_vm9, %v764_v12 }
 0x57f   : > { %1444 = vmatprep.mubr.msk.bf16.mxu0 (%p629_p6), %vm1591_vm10, %v1590_v45 }
 0x651   : >> { %v807_v13 = vpop.f32.mrb[4].mxu0 }
 0x652   : >> { %v813_v14 = vpack.c.bf16 %v807_v13, %v807_v13  ;;  %v1404_v15 = vpop.f32.mrb[5].mxu0 }
 0x653   : >> { %v810_v16 = vpop.f32.mrb[6].mxu0 }
 0x654   : >> { %v1405_v17 = vpop.f32.mrb[7].mxu0  ;;  %1409 = vmatmul.mubr.msk.bf16.vlgmr.msra.gmra.mrb[4].mxu1 %vm704_vm5, %v813_v14 }
 0x655   : > { %1416 = vmatprep.mubr.msk.bf16.mxu1 (%p629_p6), %vm1591_vm10, %v1590_v45  ;;  %1413 = vmatpush3.bf16.msra.mxu1 (%p629_p6), %v1516_v44 }
 0x656   : > { %1414 = vmatprep.subr.bf16.mxu1 (%p629_p6), %v1590_v45 }
 0x724   : > { %631 = sbr.rel (!%p629_p6) target bundleno = 652 (0x28c), region = 136 }
 0x727   : >> { %v858_v18 = vpop.f32.mrb[4].mxu1 }
 0x728   : >> { %v864_v19 = vadd.f32 %v1580_v47, %v858_v18   ;;  %v1410_v20 = vpop.f32.mrb[5].mxu1 }
 0x729   : >> { %v861_v21 = vpop.f32.mrb[6].mxu1 }
 0x72a   : >> { %v1411_v22 = vpop.f32.mrb[7].mxu1  ;;  %v1864_v47 = vmov %v864_v19  ;;  %v866_v23 = vsel (%p629_p6), %vm437_vm0, %v864_v19, 0.0 }
 0x72b   : > { %867 = vadd.xlane.f32.xlu0 %v866_v23 }
 0x7b8   : > { %v868_v24 = vpop.xlane.xlu0 %867 }
 0x7b9   : > { %v869_v25 = vmul.f32 0.03125, %v868_v24 }
 0x7bb   : > { %v870_v26 = vsub.f32 %v864_v19, %v869_v25 }
 0x7bd   : > { %v871_v27 = vmul.f32 %v870_v26, %v870_v26 }
 0x7bf   : > { %v872_v28 = vsel %vm437_vm0, %v871_v27, 0.0  ;;  %v1520_v27 = vld [vmem:[%s1862_s11] sm:$0xff]  }
 0x7c0   : > { %873 = vadd.xlane.f32.xlu0 %v872_v28  ;;  %1429 = vmatpush3.bf16.msra.mxu0 %v1520_v27  ;;  %v1521_v28 = vld [vmem:[%s1862_s11 + $0x8] sm:$0xff]  }
 0x7c1   : > { %1430 = vmatprep.subr.bf16.mxu0 %v1590_v45 }
 0x7c4   : > { %1431 = vmatpush3.bf16.msra.mxu0 %v1521_v28 }
 0x7c5   : > { %1432 = vmatprep.subr.bf16.mxu0 %v1590_v45 }
 0x84d   : > { %v874_v29 = vpop.xlane.xlu0 %873 }
 0x84e   : > { %v875_v30 = vmul.f32 0.03125, %v874_v29  ;;  %v1522_v29 = vld [vmem:[%s1862_s11 + $0x10] sm:$0xff]  }
 0x84f   : > { %1433 = vmatpush3.bf16.msra.mxu0 %v1522_v29 }
 0x850   : > { %v876_v31 = vadd.f32 1e-05, %v875_v30  ;;  %1434 = vmatprep.subr.bf16.mxu0 %v1590_v45 }
 0x852   : > { %1528 = vrsqrt.f32 %v876_v31 }
 0x85c   : > { %v1529_v33 = vpop.eup %1528 }
 0x85d   : > { %v878_v35 = vmul.f32 %v1529_v33, %v870_v26 }
 0x85f   : > { %v885_v36 = vmul.f32 %v1318_v34, %v878_v35 }
 0x861   : > { %v1770_v37 = vadd.f32 %v885_v36, %v1710_v32  ;;  %v1517_v32 = vld [vmem:[%s1859_s8 + $0x8] sm:$0xff]   ;;  %v1523_v36 = vld [vmem:[%s1862_s11 + $0x18] sm:$0xff]  }
 0x862   : > { %1415 = vmatpush3.bf16.msra.mxu1 %v1517_v32  ;;  %1435 = vmatpush3.bf16.msra.mxu0 %v1523_v36 }
 0x863   : > { %v888_v38 = vsel %vm437_vm0, %v1770_v37, 0.0  ;;  %1420 = vmatprep.subr.bf16.mxu1 %v1590_v45  ;;  %1436 = vmatprep.subr.bf16.mxu0 %v1590_v45 }
 0x864   : > { %889 = vadd.xlane.f32.xlu1 %v888_v38  ;;  %v1524_v38 = vld [vmem:[%s1862_s11 + $0x20] sm:$0xff]  }
 0x866   : > { %1437 = vmatpush3.bf16.msra.mxu0 %v1524_v38 }
 0x867   : > { %1438 = vmatprep.subr.bf16.mxu0 %v1590_v45 }
 0x8f1   : > { %v890_v39 = vpop.xlane.xlu1 %889 }
 0x8f2   : > { %v891_v40 = vmul.f32 0.03125, %v890_v39  ;;  %v1525_v39 = vld [vmem:[%s1862_s11 + $0x28] sm:$0xff]  }
 0x8f3   : > { %1439 = vmatpush3.bf16.msra.mxu0 %v1525_v39 }
 0x8f4   : > { %v892_v41 = vsub.f32 %v1770_v37, %v891_v40  ;;  %v1526_v40 = vld [vmem:[%s1862_s11 + $0x30] sm:$0xff]   ;;  %1440 = vmatprep.subr.bf16.mxu0 %v1590_v45 }
 0x8f6   : > { %v893_v42 = vmul.f32 %v892_v41, %v892_v41 }
 0x8f7   : > { %1441 = vmatpush3.bf16.msra.mxu0 %v1526_v40 }
 0x8f8   : > { %v894_v43 = vsel %vm437_vm0, %v893_v42, 0.0  ;;  %1442 = vmatprep.subr.bf16.mxu0 %v1590_v45 }
 0x8f9   : > { %895 = vadd.xlane.f32.xlu1 %v894_v43 }
 0x986   : > { %v896_v46 = vpop.xlane.xlu1 %895 }
 0x987   : > { %v897_v47 = vmul.f32 0.03125, %v896_v46  ;;  %v1326_v46 = vld [vmem:[%s1861_s10] ss:$0 sm:$0xff] }
 0x989   : > { %v898_v48 = vadd.f32 1e-05, %v897_v47 }
 0x98b   : > { %1530 = vrsqrt.f32 %v898_v48 }
 0x995   : > { %v1531_v49 = vpop.eup %1530 }
 0x996   : > { %v900_v51 = vmul.f32 %v1531_v49, %v892_v41  ;;  %v1527_v41 = vld [vmem:[%s1862_s11 + $0x38] sm:$0xff]  }
 0x997   : > { %1443 = vmatpush3.bf16.msra.mxu0 %v1527_v41 }
 0x998   : > { %v907_v52 = vmul.f32 %v1319_v50, %v900_v51 }
 0x99a   : > { %v908_v54 = vpack.c.bf16 %v907_v52, %v907_v52 }
 0x99c   : > { %1417 = vmatmul.mubr.msk.bf16.vlgmr.msra.gmra.mrb[0].mxu1 %vm485_vm2, %v908_v54 }
 0x99d   : > { %1421 = vmatpush3.bf16.msra.mxu1 %v1518_v53  ;;  %1424 = vmatprep.mubr.msk.bf16.mxu1 %vm1591_vm10, %v1590_v45 }
 0x99e   : > { %1422 = vmatprep.subr.bf16.mxu1 %v1590_v45 }
 0x9a1   : > { %1423 = vmatpush3.bf16.msra.mxu1 %v1519_v55 }
 0x9a4   : > { %1425 = vmatmul.mubr.msk.bf16.vlgmr.msra.gmra.mrb[4].mxu1 %vm485_vm2, %v908_v54 }
 0xa6f   : > { %v963_v56 = vpop.f32.mrb[0].mxu1 }
 0xa70   : > { %v1418_v57 = vpop.f32.mrb[1].mxu1 }
 0xa71   : > { %v966_v58 = vpop.f32.mrb[2].mxu1 }
 0xa72   : > { %v1419_v59 = vpop.f32.mrb[3].mxu1 }
 0xa77   : > { %v1019_v60 = vpop.f32.mrb[4].mxu1 }
 0xa78   : > { %v1025_v61 = vmul.f32 0.70710677, %v1019_v60  ;;  %v1426_v62 = vpop.f32.mrb[5].mxu1  ;;  %v1049_v22 = vmul.f32 0.5, %v1019_v60 }
 0xa79   : > { %v1022_v63 = vpop.f32.mrb[6].mxu1 }
 0xa7a   : > { %v1026_v0 = vand.u32 2147483647, %v1025_v61  ;;  %v1427_v1 = vpop.f32.mrb[7].mxu1  ;;  %vm1046_vm11 = vcmp.ge.f32.partialorder %v1025_v61, 0.0 }
 0xa7c   : > { %v1027_v2 = vmul.f32 0.3275911, %v1026_v0  ;;  %v1040_v4 = vsub.f32 0.0, %v1026_v0 }
 0xa7e   : > { %v1028_v3 = vadd.f32 1.0, %v1027_v2  ;;  %v1041_v6 = vmul.f32 %v1040_v4, %v1026_v0 }
 0xa80   : > { %1532 = vrcp.f32 %v1028_v3  ;;  %v1042_v9 = vmul.f32 1.442695, %v1041_v6 }
 0xa82   : > { %1534 = vpow2.f32 %v1042_v9 }
 0xa8a   : > { %v1533_v5 = vpop.eup %1532 }
 0xa8b   : > { %v1031_v7 = vmul.f32 1.0614054, %v1533_v5 }
 0xa8c   : > { %v1535_v17 = vpop.eup %1534 }
 0xa8d   : > { %v1032_v8 = vadd.f32 -1.4531521, %v1031_v7 }
 0xa8f   : > { %v1033_v10 = vmul.f32 %v1533_v5, %v1032_v8 }
 0xa91   : > { %v1034_v11 = vadd.f32 1.4214138, %v1033_v10 }
 0xa93   : > { %v1035_v12 = vmul.f32 %v1533_v5, %v1034_v11 }
 0xa95   : > { %v1036_v13 = vadd.f32 -0.28449672, %v1035_v12 }
 0xa97   : > { %v1037_v14 = vmul.f32 %v1533_v5, %v1036_v13 }
 0xa99   : > { %v1038_v15 = vadd.f32 0.2548296, %v1037_v14 }
 0xa9b   : > { %v1039_v16 = vmul.f32 %v1533_v5, %v1038_v15 }
 0xa9d   : > { %v1044_v18 = vmul.f32 %v1535_v17, %v1039_v16 }
 0xa9f   : > { %v1045_v19 = vsub.f32 1.0, %v1044_v18 }
 0xaa1   : > { %v1047_v20 = vsub.f32 0.0, %v1045_v19 }
 0xaa3   : > { %v1048_v21 = vsel %vm1046_vm11, %v1045_v19, %v1047_v20 }
 0xaa4   : > { %v1050_v23 = vadd.f32 1.0, %v1048_v21 }
 0xaa6   : > { %v1051_v24 = vmul.f32 %v1050_v23, %v1049_v22 }
 0xaa8   : > { %v1052_v25 = vmul.f32 %v1051_v24, %v963_v56 }
 0xaaa   : > { %v1055_v26 = vsel %vm820_vm8, %v1052_v25, 0.0 }
 0xaab   : > { %1056 = vadd.xlane.f32.xlu0 %v1055_v26 }
 0xb38   : > { %v1057_v30 = vpop.xlane.xlu0 %1056 }
 0xb39   : > { %v1059_v31 = vmul.f32 0.0078125, %v1057_v30 }
 0xb3b   : > { %v1060_v33 = vsub.f32 %v1052_v25, %v1059_v31 }
 0xb3d   : > { %v1061_v34 = vmul.f32 %v1060_v33, %v1060_v33 }
 0xb3f   : > { %v1062_v35 = vsel %vm820_vm8, %v1061_v34, 0.0 }
 0xb40   : > { %1063 = vadd.xlane.f32.xlu1 %v1062_v35 }
 0xbcd   : > { %v1064_v42 = vpop.xlane.xlu1 %1063 }
 0xbce   : > { %v1065_v43 = vmul.f32 0.0078125, %v1064_v42 }
 0xbd0   : > { %v1066_v44 = vadd.f32 1e-05, %v1065_v43 }
 0xbd2   : > { %1536 = vrsqrt.f32 %v1066_v44 }
 0xbdc   : > { %v1537_v32 = vpop.eup %1536 }
 0xbdd   : > { %v1068_v47 = vmul.f32 %v1537_v32, %v1060_v33 }
 0xbdf   : > { %v1075_v48 = vmul.f32 %v1326_v46, %v1068_v47 }
 0xbe1   : > { %v1076_v49 = vpack.c.bf16 %v1075_v48, %v1075_v48 }
 0xbe3   : > { %1445 = vmatmul.mubr.bf16.vlgmr.msra.gmra.mrb[0].mxu0 %v1076_v49 }
 0xcb6   : > { %v1175_v50 = vpop.f32.mrb[0].mxu0 }
 0xcb7   : > { %v1181_v51 = vadd.f32 %v1175_v50, %v1770_v37  ;;  %v1446_v52 = vpop.f32.mrb[1].mxu0 }
 0xcb8   : > { %v1178_v45 = vpop.f32.mrb[2].mxu0 }
 0xcb9   : > { %v1182_v53 = vpack.c.bf16 %v1181_v51, %v1181_v51  ;;  %v1447_v54 = vpop.f32.mrb[3].mxu0 }
 0xcbb   : > { %1184 = vst.msk [vmem:[%s1683_s13] sm:$0x3] %vm1183_vm12, %v1182_v53 }
 0xcbc PF: > { %s22_s23 = sadd.s32 1, %s1572_s23   ;;  %s1865_s21 = smov %s1568_s22 }
 0xcbd   : > { %p19_p7 = scmp.ge.s32.totalorder %s22_s23, 4   ;;  %s1866_s22 = smov %s1868_s24 }
 0xcbf   :  { %21 = sbr.rel (!%p19_p7) target bundleno = 2 (0x2), region = 147 }

</bundles_post_ra>
